<compile_context>
chip_gen: v5e
topology: v5e:2x2
jax: 0.10.0
libtpu: 0.0.40
codegen_flags: <defaults>
</compile_context>

<pallas_src>
import functools

import numpy as np

import jax
import jax.numpy as jnp
from jax.experimental import pallas as pl
from jax.experimental.pallas import tpu as pltpu


def _conv_out_hw(h, w, k, stride, padding):
    return ((h + 2 * padding - k) // stride + 1,
            (w + 2 * padding - k) // stride + 1)


# ----------------------------------------------------------------------------
# Fused kernel: one grid step == one sample; whole net stays in VMEM.
# ----------------------------------------------------------------------------
def _fused_net_kernel(cols1_ref, w1_ref, b1_ref,
                      s2_ref, w2_ref, b2_ref,
                      s3_ref, w3_ref, b3_ref,
                      wf1_ref, bf1_ref, wf2_ref, bf2_ref,
                      out_ref):
    f32 = jnp.float32
    bf16 = jnp.bfloat16

    # ---- conv1 (im2col done in the wrapper): (P1, K1) @ (K1, C1) + b, ReLU --
    h = jnp.dot(cols1_ref[...], w1_ref[...], preferred_element_type=f32)
    h = jnp.maximum(h + b1_ref[...], 0.0).astype(bf16)            # (P1, C1)

    # ---- conv2 / conv3 as "gather-as-matmul" convolutions -------------------
    def conv_sel(x, s_ref, w_ref, b_ref):
        # x:     (P_in, Cin)  bf16   activations (rows = spatial positions)
        # s_ref: (KK, P_out, P_in)   0/1 bf16 selection matrices (one per
        #                            kernel position) -- pure MXU gather.
        # w_ref: (KK, Cin, Cout) bf16, b_ref: (1, Cout) f32
        kk_n, p_out, _ = s_ref.shape
        cout = w_ref.shape[2]
        acc = jnp.zeros((p_out, cout), f32)
        for kk in range(kk_n):                       # statically unrolled
            g = jnp.dot(s_ref[kk], x, preferred_element_type=f32)   # exact row copies
            acc = acc + jnp.dot(g.astype(bf16), w_ref[kk],
                                preferred_element_type=f32)
        return jnp.maximum(acc + b_ref[...], 0.0).astype(bf16)

    h = conv_sel(h, s2_ref, w2_ref, b2_ref)                        # (P2, C2)
    h = conv_sel(h, s3_ref, w3_ref, b3_ref)                        # (P3, C3)

    # ---- fc1: NCHW flatten handled by per-spatial-position weight slabs -----
    n_sp, _, hidden = wf1_ref.shape
    acc = jnp.zeros((1, hidden), f32)
    for p in range(n_sp):                                          # n_sp == 1 here
        acc = acc + jnp.dot(h[p:p + 1, :], wf1_ref[p],
                            preferred_element_type=f32)
    h = jnp.maximum(acc + bf1_ref[...], 0.0).astype(bf16)          # (1, 512)

    # ---- fc2 (no ReLU) -------------------------------------------------------
    q = jnp.dot(h, wf2_ref[...], preferred_element_type=f32) + bf2_ref[...]
    out_ref[...] = q.astype(out_ref.dtype)                         # (1, n_actions)


# ----------------------------------------------------------------------------
# Wrapper-side layout helpers (tiny XLA ops, executed once / fused by XLA)
# ----------------------------------------------------------------------------
def _im2col_conv1(x_nhwc, kh, kw, stride, padding):
    """(N, H, W, C) -> (N, Ho*Wo, kh*kw*C) with K ordered (kh, kw, C)."""
    if padding:
        x_nhwc = jnp.pad(
            x_nhwc, ((0, 0), (padding, padding), (padding, padding), (0, 0)))
    n, h, w, c = x_nhwc.shape
    ho = (h - kh) // stride + 1
    wo = (w - kw) // stride + 1
    patches = []
    for i in range(kh):
        for j in range(kw):
            patches.append(
                x_nhwc[:, i:i + stride * ho:stride, j:j + stride * wo:stride, :])
    cols = jnp.stack(patches, axis=3)                 # (N, Ho, Wo, kh*kw, C)
    return cols.reshape(n, ho * wo, kh * kw * c)


def _selection_matrices(h_in, w_in, k, stride):
    """0/1 gather matrices: sel[kk, p_out, p_in] for a k x k / stride conv."""
    ho = (h_in - k) // stride + 1
    wo = (w_in - k) // stride + 1
    sel = np.zeros((k * k, ho * wo, h_in * w_in), np.float32)
    for i in range(k):
        for j in range(k):
            kk = i * k + j
            for oy in range(ho):
                for ox in range(wo):
                    q = (oy * stride + i) * w_in + (ox * stride + j)
                    sel[kk, oy * wo + ox, q] = 1.0
    return jnp.asarray(sel, jnp.bfloat16), ho, wo


# ----------------------------------------------------------------------------
# Parameter construction (matches nn.Module __init__ shapes) + one-time prep
# ----------------------------------------------------------------------------
def init_params(key, n_actions, fc1_in):
    ks = jax.random.split(key, 10)
    scale = 0.05
    return {
        "conv1_w": jax.random.normal(ks[0], (32, 4, 8, 8), jnp.float32) * scale,
        "conv1_b": jax.random.normal(ks[1], (32,), jnp.float32) * scale,
        "conv2_w": jax.random.normal(ks[2], (64, 32, 4, 4), jnp.float32) * scale,
        "conv2_b": jax.random.normal(ks[3], (64,), jnp.float32) * scale,
        "conv3_w": jax.random.normal(ks[4], (64, 64, 3, 3), jnp.float32) * scale,
        "conv3_b": jax.random.normal(ks[5], (64,), jnp.float32) * scale,
        "fc1_w": jax.random.normal(ks[6], (512, fc1_in), jnp.float32) * scale,
        "fc1_b": jax.random.normal(ks[7], (512,), jnp.float32) * scale,
        "fc2_w": jax.random.normal(ks[8], (n_actions, 512), jnp.float32) * scale,
        "fc2_b": jax.random.normal(ks[9], (n_actions,), jnp.float32) * scale,
    }


def prepare_params(params, input_dims):
    """One-time weight transform: transpose / re-layout / cast to bf16."""
    _, h, w = input_dims
    h1, w1 = _conv_out_hw(h, w, 8, 4, 1)
    h2, w2 = _conv_out_hw(h1, w1, 4, 2, 0)
    h3, w3 = _conv_out_hw(h2, w2, 3, 1, 0)

    def conv_gemm_weight(w_oihw):          # conv1: (KH*KW*Cin, Cout), (kh,kw,cin) K order
        cout, cin, kh, kw = w_oihw.shape
        return (jnp.transpose(w_oihw, (2, 3, 1, 0))
                .reshape(kh * kw * cin, cout).astype(jnp.bfloat16))

    def conv_perpos_weight(w_oihw):        # conv2/3: (KH*KW, Cin, Cout)
        cout, cin, kh, kw = w_oihw.shape
        return (jnp.transpose(w_oihw, (2, 3, 1, 0))
                .reshape(kh * kw, cin, cout).astype(jnp.bfloat16))

    def bias_row(b):
        return b.astype(jnp.float32).reshape(1, -1)

    s2, h2c, w2c = _selection_matrices(h1, w1, 4, 2)
    s3, h3c, w3c = _selection_matrices(h2, w2, 3, 1)
    assert (h2c, w2c) == (h2, w2) and (h3c, w3c) == (h3, w3)

    # fc1 consumes PyTorch's NCHW-flatten of the conv3 output; re-arrange its
    # weight into per-spatial-position (n_sp3, C3, 512) slabs so the kernel
    # never has to transpose / flatten activations.
    c3 = params["conv3_w"].shape[0]
    n_sp3 = h3 * w3
    fc1_w = params["fc1_w"]
    out_dim, fc1_in = fc1_w.shape
    assert fc1_in == c3 * n_sp3
    wf1 = (fc1_w.reshape(out_dim, c3, n_sp3)
           .transpose(2, 1, 0).astype(jnp.bfloat16))     # (n_sp3, C3, 512)

    return {
        "conv1_geom": (8, 4, 1),                         # (k, stride, padding)
        "w1": conv_gemm_weight(params["conv1_w"]), "b1": bias_row(params["conv1_b"]),
        "s2": s2, "w2": conv_perpos_weight(params["conv2_w"]),
        "b2": bias_row(params["conv2_b"]),
        "s3": s3, "w3": conv_perpos_weight(params["conv3_w"]),
        "b3": bias_row(params["conv3_b"]),
        "wf1": wf1, "bf1": bias_row(params["fc1_b"]),
        "wf2": params["fc2_w"].T.astype(jnp.bfloat16), "bf2": bias_row(params["fc2_b"]),
    }


# ----------------------------------------------------------------------------
# Forward pass (equivalent to TorchConvnet._forward_batch / _forward_single)
# ----------------------------------------------------------------------------
def torch_convnet_forward(prep, x_nchw):
    """x_nchw: (N, 4, H, W) float32 -> (N, n_actions) float32."""
    n = x_nchw.shape[0]
    k1, st1, pd1 = prep["conv1_geom"]

    # NCHW -> NHWC, cast to bf16 BEFORE im2col (halves the patch-buffer bytes).
    x = jnp.transpose(x_nchw, (0, 2, 3, 1)).astype(jnp.bfloat16)
    cols1 = _im2col_conv1(x, k1, k1, st1, pd1)           # (N, P1, K1) bf16
    _, p1, kdim = cols1.shape

    w1, b1 = prep["w1"], prep["b1"]
    s2, w2, b2 = prep["s2"], prep["w2"], prep["b2"]
    s3, w3, b3 = prep["s3"], prep["w3"], prep["b3"]
    wf1, bf1 = prep["wf1"], prep["bf1"]
    wf2, bf2 = prep["wf2"], prep["bf2"]
    n_actions = wf2.shape[1]

    # Advisory cost estimate for the XLA scheduler.
    flops_per_sample = 2 * (
        p1 * kdim * w1.shape[1]
        + s2.shape[0] * (s2.shape[1] * s2.shape[2] * w2.shape[1]
                         + s2.shape[1] * w2.shape[1] * w2.shape[2])
        + s3.shape[0] * (s3.shape[1] * s3.shape[2] * w3.shape[1]
                         + s3.shape[1] * w3.shape[1] * w3.shape[2])
        + wf1.shape[0] * wf1.shape[1] * wf1.shape[2]
        + wf2.shape[0] * wf2.shape[1])
    weight_bytes = sum(int(np.prod(a.shape)) * a.dtype.itemsize
                       for a in (w1, b1, s2, w2, b2, s3, w3, b3,
                                 wf1, bf1, wf2, bf2))
    cost = pl.CostEstimate(
        flops=n * flops_per_sample, transcendentals=0,
        bytes_accessed=n * (p1 * kdim * 2 + n_actions * 4) + weight_bytes)

    def resident(arr):
        # Full-array block, constant index -> stays VMEM-resident across grid.
        zeros = (0,) * arr.ndim
        return pl.BlockSpec(arr.shape, lambda b: zeros)

    out = pl.pallas_call(
        _fused_net_kernel,
        out_shape=jax.ShapeDtypeStruct((n, 1, n_actions), jnp.float32),
        grid=(n,),                                       # one sample per step
        in_specs=[
            pl.BlockSpec((None, p1, kdim), lambda b: (b, 0, 0)),   # conv1 patches
            resident(w1), resident(b1),
            resident(s2), resident(w2), resident(b2),
            resident(s3), resident(w3), resident(b3),
            resident(wf1), resident(bf1),
            resident(wf2), resident(bf2),
        ],
        out_specs=pl.BlockSpec((None, 1, n_actions), lambda b: (b, 0, 0)),
        compiler_params=pltpu.CompilerParams(
            dimension_semantics=("parallel",),           # batch across v7x's 2 TCs
            vmem_limit_bytes=32 * 1024 * 1024),          # safe on v5e/v6e/v7x
        cost_estimate=cost,
    )(cols1, w1, b1, s2, w2, b2, s3, w3, b3, wf1, bf1, wf2, bf2)
    return out.reshape(n, n_actions)


# ----------------------------------------------------------------------------
# Pure-JAX reference with the same bf16-in / f32-accumulate numerics
# ----------------------------------------------------------------------------
def reference_forward(params, x_nchw):
    bf16 = jnp.bfloat16

    def conv(x, w_oihw, b, stride, padding):
        w = jnp.transpose(w_oihw, (2, 3, 1, 0)).astype(bf16)      # HWIO
        y = jax.lax.conv_general_dilated(
            x.astype(bf16), w, (stride, stride),
            [(padding, padding), (padding, padding)],
            dimension_numbers=("NHWC", "HWIO", "NHWC"),
            preferred_element_type=jnp.float32)
        return jax.nn.relu(y + b.astype(jnp.float32))

    x = jnp.transpose(x_nchw, (0, 2, 3, 1))
    x = conv(x, params["conv1_w"], params["conv1_b"], 4, 1)
    x = conv(x, params["conv2_w"], params["conv2_b"], 2, 0)
    x = conv(x, params["conv3_w"], params["conv3_b"], 1, 0)
    n = x.shape[0]
    x = jnp.transpose(x, (0, 3, 1, 2)).reshape(n, -1)             # NCHW flatten
    x = jax.nn.relu(
        jnp.dot(x.astype(bf16), params["fc1_w"].T.astype(bf16),
                preferred_element_type=jnp.float32)
        + params["fc1_b"].astype(jnp.float32))
    return (jnp.dot(x.astype(bf16), params["fc2_w"].T.astype(bf16),
                    preferred_element_type=jnp.float32)
            + params["fc2_b"].astype(jnp.float32))


# ----------------------------------------------------------------------------
# Main
# ----------------------------------------------------------------------------
if __name__ == "__main__":
    # input_dims=(4, 36, 36): conv1 -> 8x8, conv2 -> 3x3, conv3 -> 1x1,
    # so fc1 input = 64 * 1 * 1 = 64 (matches the module's construction).
    batch = 2
    n_actions = 6
    input_dims = (4, 36, 36)

    _, H, W = input_dims
    h1, w1 = _conv_out_hw(H, W, 8, 4, 1)
    h2, w2 = _conv_out_hw(h1, w1, 4, 2, 0)
    h3, w3 = _conv_out_hw(h2, w2, 3, 1, 0)
    fc1_in = 64 * h3 * w3

    key = jax.random.PRNGKey(0)
    k_params, k_x = jax.random.split(key)
    params = init_params(k_params, n_actions, fc1_in)
    prep = prepare_params(params, input_dims)            # one-time weight prep
    x = jax.random.normal(k_x, (batch,) + input_dims, jnp.float32)

    fwd = jax.jit(functools.partial(torch_convnet_forward, prep))
    out = fwd(x)
    jax.block_until_ready(out)

    assert out.shape == (batch, n_actions), out.shape
    assert out.dtype == jnp.float32
    assert bool(jnp.all(jnp.isfinite(out)))

    # Numerics check vs a pure-JAX reference using the same bf16/f32 policy
    # (bf16 MXU inputs is a deliberate precision trade vs. the f32 PyTorch ref).
    ref = reference_forward(params, x)
    max_err = float(jnp.max(jnp.abs(out - ref)))
    assert max_err < 2e-2, f"mismatch vs pure-JAX reference: {max_err}"

    print("KERNEL_OK")
</pallas_src>

<mosaic_0001>
module attributes {stable_mosaic.version = 11 : i64} {
  func.func @_fused_net_kernel(%arg0: i32, %arg1: memref<1x64x256xbf16, #tpu.memory_space<vmem>>, %arg2: memref<256x32xbf16, #tpu.memory_space<vmem>>, %arg3: memref<1x32xf32, #tpu.memory_space<vmem>>, %arg4: memref<16x9x64xbf16, #tpu.memory_space<vmem>>, %arg5: memref<16x32x64xbf16, #tpu.memory_space<vmem>>, %arg6: memref<1x64xf32, #tpu.memory_space<vmem>>, %arg7: memref<9x1x9xbf16, #tpu.memory_space<vmem>>, %arg8: memref<9x64x64xbf16, #tpu.memory_space<vmem>>, %arg9: memref<1x64xf32, #tpu.memory_space<vmem>>, %arg10: memref<1x64x512xbf16, #tpu.memory_space<vmem>>, %arg11: memref<1x512xf32, #tpu.memory_space<vmem>>, %arg12: memref<512x6xbf16, #tpu.memory_space<vmem>>, %arg13: memref<1x6xf32, #tpu.memory_space<vmem>>, %arg14: memref<1x1x6xf32, #tpu.memory_space<vmem>>) attributes {dimension_semantics = [#tpu.dimension_semantics<parallel>], iteration_bounds = array<i64: 2>, scalar_prefetch = 0 : i64, scratch_operands = 0 : i64, tpu.core_type = #tpu.core_type<tc>, window_params = [{transform_indices = @transform_0, window_bounds = array<i64: 1, 64, 256>}, {pipeline_mode = #tpu.pipeline_mode<synchronous>, transform_indices = @transform_1, window_bounds = array<i64: 256, 32>}, {pipeline_mode = #tpu.pipeline_mode<synchronous>, transform_indices = @transform_2, window_bounds = array<i64: 1, 32>}, {pipeline_mode = #tpu.pipeline_mode<synchronous>, transform_indices = @transform_3, window_bounds = array<i64: 16, 9, 64>}, {pipeline_mode = #tpu.pipeline_mode<synchronous>, transform_indices = @transform_4, window_bounds = array<i64: 16, 32, 64>}, {pipeline_mode = #tpu.pipeline_mode<synchronous>, transform_indices = @transform_5, window_bounds = array<i64: 1, 64>}, {pipeline_mode = #tpu.pipeline_mode<synchronous>, transform_indices = @transform_6, window_bounds = array<i64: 9, 1, 9>}, {pipeline_mode = #tpu.pipeline_mode<synchronous>, transform_indices = @transform_7, window_bounds = array<i64: 9, 64, 64>}, {pipeline_mode = #tpu.pipeline_mode<synchronous>, transform_indices = @transform_8, window_bounds = array<i64: 1, 64>}, {pipeline_mode = #tpu.pipeline_mode<synchronous>, transform_indices = @transform_9, window_bounds = array<i64: 1, 64, 512>}, {pipeline_mode = #tpu.pipeline_mode<synchronous>, transform_indices = @transform_10, window_bounds = array<i64: 1, 512>}, {pipeline_mode = #tpu.pipeline_mode<synchronous>, transform_indices = @transform_11, window_bounds = array<i64: 512, 6>}, {pipeline_mode = #tpu.pipeline_mode<synchronous>, transform_indices = @transform_12, window_bounds = array<i64: 1, 6>}, {transform_indices = @transform_13, window_bounds = array<i64: 1, 1, 6>}]} {
    %c0 = arith.constant 0 : index
    %c0_0 = arith.constant 0 : index
    %c0_1 = arith.constant 0 : index
    %0 = vector.load %arg1[%c0, %c0_0, %c0_1] : memref<1x64x256xbf16, #tpu.memory_space<vmem>>, vector<1x64x256xbf16>
    %1 = vector.shape_cast %0 : vector<1x64x256xbf16> to vector<64x256xbf16>
    %c0_2 = arith.constant 0 : index
    %c0_3 = arith.constant 0 : index
    %2 = vector.load %arg2[%c0_2, %c0_3] : memref<256x32xbf16, #tpu.memory_space<vmem>>, vector<256x32xbf16>
    %cst = arith.constant dense<0.000000e+00> : vector<64x32xf32>
    %3 = tpu.matmul %1, %2, %cst {dimension_numbers = #tpu.dot_dimension_numbers<[1], [0], [0], [1], [0, 0, 1, 1], [], []>} : vector<64x256xbf16>, vector<256x32xbf16>, vector<64x32xf32> -> vector<64x32xf32>
    %c0_4 = arith.constant 0 : index
    %c0_5 = arith.constant 0 : index
    %4 = vector.load %arg3[%c0_4, %c0_5] : memref<1x32xf32, #tpu.memory_space<vmem>>, vector<1x32xf32>
    %5 = vector.broadcast %4 : vector<1x32xf32> to vector<64x32xf32>
    %6 = arith.addf %3, %5 : vector<64x32xf32>
    %cst_6 = arith.constant 0.000000e+00 : f32
    %7 = vector.broadcast %cst_6 : f32 to vector<64x32xf32>
    %8 = arith.maximumf %6, %7 : vector<64x32xf32>
    %9 = arith.truncf %8 : vector<64x32xf32> to vector<64x32xbf16>
    %cst_7 = arith.constant 0.000000e+00 : f32
    %10 = vector.broadcast %cst_7 : f32 to vector<9x64xf32>
    %c0_8 = arith.constant 0 : index
    %c0_9 = arith.constant 0 : index
    %c0_10 = arith.constant 0 : index
    %11 = vector.load %arg4[%c0_8, %c0_9, %c0_10] : memref<16x9x64xbf16, #tpu.memory_space<vmem>>, vector<1x9x64xbf16>
    %12 = vector.shape_cast %11 : vector<1x9x64xbf16> to vector<9x64xbf16>
    %cst_11 = arith.constant dense<0.000000e+00> : vector<9x32xf32>
    %13 = tpu.matmul %12, %9, %cst_11 {dimension_numbers = #tpu.dot_dimension_numbers<[1], [0], [0], [1], [0, 0, 1, 1], [], []>} : vector<9x64xbf16>, vector<64x32xbf16>, vector<9x32xf32> -> vector<9x32xf32>
    %14 = arith.truncf %13 : vector<9x32xf32> to vector<9x32xbf16>
    %c0_12 = arith.constant 0 : index
    %c0_13 = arith.constant 0 : index
    %c0_14 = arith.constant 0 : index
    %15 = vector.load %arg5[%c0_12, %c0_13, %c0_14] : memref<16x32x64xbf16, #tpu.memory_space<vmem>>, vector<1x32x64xbf16>
    %16 = vector.shape_cast %15 : vector<1x32x64xbf16> to vector<32x64xbf16>
    %cst_15 = arith.constant dense<0.000000e+00> : vector<9x64xf32>
    %17 = tpu.matmul %14, %16, %cst_15 {dimension_numbers = #tpu.dot_dimension_numbers<[1], [0], [0], [1], [0, 0, 1, 1], [], []>} : vector<9x32xbf16>, vector<32x64xbf16>, vector<9x64xf32> -> vector<9x64xf32>
    %18 = arith.addf %10, %17 : vector<9x64xf32>
    %c1 = arith.constant 1 : index
    %c0_16 = arith.constant 0 : index
    %c0_17 = arith.constant 0 : index
    %19 = vector.load %arg4[%c1, %c0_16, %c0_17] : memref<16x9x64xbf16, #tpu.memory_space<vmem>>, vector<1x9x64xbf16>
    %20 = vector.shape_cast %19 : vector<1x9x64xbf16> to vector<9x64xbf16>
    %cst_18 = arith.constant dense<0.000000e+00> : vector<9x32xf32>
    %21 = tpu.matmul %20, %9, %cst_18 {dimension_numbers = #tpu.dot_dimension_numbers<[1], [0], [0], [1], [0, 0, 1, 1], [], []>} : vector<9x64xbf16>, vector<64x32xbf16>, vector<9x32xf32> -> vector<9x32xf32>
    %22 = arith.truncf %21 : vector<9x32xf32> to vector<9x32xbf16>
    %c1_19 = arith.constant 1 : index
    %c0_20 = arith.constant 0 : index
    %c0_21 = arith.constant 0 : index
    %23 = vector.load %arg5[%c1_19, %c0_20, %c0_21] : memref<16x32x64xbf16, #tpu.memory_space<vmem>>, vector<1x32x64xbf16>
    %24 = vector.shape_cast %23 : vector<1x32x64xbf16> to vector<32x64xbf16>
    %cst_22 = arith.constant dense<0.000000e+00> : vector<9x64xf32>
    %25 = tpu.matmul %22, %24, %cst_22 {dimension_numbers = #tpu.dot_dimension_numbers<[1], [0], [0], [1], [0, 0, 1, 1], [], []>} : vector<9x32xbf16>, vector<32x64xbf16>, vector<9x64xf32> -> vector<9x64xf32>
    %26 = arith.addf %18, %25 : vector<9x64xf32>
    %c2 = arith.constant 2 : index
    %c0_23 = arith.constant 0 : index
    %c0_24 = arith.constant 0 : index
    %27 = vector.load %arg4[%c2, %c0_23, %c0_24] : memref<16x9x64xbf16, #tpu.memory_space<vmem>>, vector<1x9x64xbf16>
    %28 = vector.shape_cast %27 : vector<1x9x64xbf16> to vector<9x64xbf16>
    %cst_25 = arith.constant dense<0.000000e+00> : vector<9x32xf32>
    %29 = tpu.matmul %28, %9, %cst_25 {dimension_numbers = #tpu.dot_dimension_numbers<[1], [0], [0], [1], [0, 0, 1, 1], [], []>} : vector<9x64xbf16>, vector<64x32xbf16>, vector<9x32xf32> -> vector<9x32xf32>
    %30 = arith.truncf %29 : vector<9x32xf32> to vector<9x32xbf16>
    %c2_26 = arith.constant 2 : index
    %c0_27 = arith.constant 0 : index
    %c0_28 = arith.constant 0 : index
    %31 = vector.load %arg5[%c2_26, %c0_27, %c0_28] : memref<16x32x64xbf16, #tpu.memory_space<vmem>>, vector<1x32x64xbf16>
    %32 = vector.shape_cast %31 : vector<1x32x64xbf16> to vector<32x64xbf16>
    %cst_29 = arith.constant dense<0.000000e+00> : vector<9x64xf32>
    %33 = tpu.matmul %30, %32, %cst_29 {dimension_numbers = #tpu.dot_dimension_numbers<[1], [0], [0], [1], [0, 0, 1, 1], [], []>} : vector<9x32xbf16>, vector<32x64xbf16>, vector<9x64xf32> -> vector<9x64xf32>
    %34 = arith.addf %26, %33 : vector<9x64xf32>
    %c3 = arith.constant 3 : index
    %c0_30 = arith.constant 0 : index
    %c0_31 = arith.constant 0 : index
    %35 = vector.load %arg4[%c3, %c0_30, %c0_31] : memref<16x9x64xbf16, #tpu.memory_space<vmem>>, vector<1x9x64xbf16>
    %36 = vector.shape_cast %35 : vector<1x9x64xbf16> to vector<9x64xbf16>
    %cst_32 = arith.constant dense<0.000000e+00> : vector<9x32xf32>
    %37 = tpu.matmul %36, %9, %cst_32 {dimension_numbers = #tpu.dot_dimension_numbers<[1], [0], [0], [1], [0, 0, 1, 1], [], []>} : vector<9x64xbf16>, vector<64x32xbf16>, vector<9x32xf32> -> vector<9x32xf32>
    %38 = arith.truncf %37 : vector<9x32xf32> to vector<9x32xbf16>
    %c3_33 = arith.constant 3 : index
    %c0_34 = arith.constant 0 : index
    %c0_35 = arith.constant 0 : index
    %39 = vector.load %arg5[%c3_33, %c0_34, %c0_35] : memref<16x32x64xbf16, #tpu.memory_space<vmem>>, vector<1x32x64xbf16>
    %40 = vector.shape_cast %39 : vector<1x32x64xbf16> to vector<32x64xbf16>
    %cst_36 = arith.constant dense<0.000000e+00> : vector<9x64xf32>
    %41 = tpu.matmul %38, %40, %cst_36 {dimension_numbers = #tpu.dot_dimension_numbers<[1], [0], [0], [1], [0, 0, 1, 1], [], []>} : vector<9x32xbf16>, vector<32x64xbf16>, vector<9x64xf32> -> vector<9x64xf32>
    %42 = arith.addf %34, %41 : vector<9x64xf32>
    %c4 = arith.constant 4 : index
    %c0_37 = arith.constant 0 : index
    %c0_38 = arith.constant 0 : index
    %43 = vector.load %arg4[%c4, %c0_37, %c0_38] : memref<16x9x64xbf16, #tpu.memory_space<vmem>>, vector<1x9x64xbf16>
    %44 = vector.shape_cast %43 : vector<1x9x64xbf16> to vector<9x64xbf16>
    %cst_39 = arith.constant dense<0.000000e+00> : vector<9x32xf32>
    %45 = tpu.matmul %44, %9, %cst_39 {dimension_numbers = #tpu.dot_dimension_numbers<[1], [0], [0], [1], [0, 0, 1, 1], [], []>} : vector<9x64xbf16>, vector<64x32xbf16>, vector<9x32xf32> -> vector<9x32xf32>
    %46 = arith.truncf %45 : vector<9x32xf32> to vector<9x32xbf16>
    %c4_40 = arith.constant 4 : index
    %c0_41 = arith.constant 0 : index
    %c0_42 = arith.constant 0 : index
    %47 = vector.load %arg5[%c4_40, %c0_41, %c0_42] : memref<16x32x64xbf16, #tpu.memory_space<vmem>>, vector<1x32x64xbf16>
    %48 = vector.shape_cast %47 : vector<1x32x64xbf16> to vector<32x64xbf16>
    %cst_43 = arith.constant dense<0.000000e+00> : vector<9x64xf32>
    %49 = tpu.matmul %46, %48, %cst_43 {dimension_numbers = #tpu.dot_dimension_numbers<[1], [0], [0], [1], [0, 0, 1, 1], [], []>} : vector<9x32xbf16>, vector<32x64xbf16>, vector<9x64xf32> -> vector<9x64xf32>
    %50 = arith.addf %42, %49 : vector<9x64xf32>
    %c5 = arith.constant 5 : index
    %c0_44 = arith.constant 0 : index
    %c0_45 = arith.constant 0 : index
    %51 = vector.load %arg4[%c5, %c0_44, %c0_45] : memref<16x9x64xbf16, #tpu.memory_space<vmem>>, vector<1x9x64xbf16>
    %52 = vector.shape_cast %51 : vector<1x9x64xbf16> to vector<9x64xbf16>
    %cst_46 = arith.constant dense<0.000000e+00> : vector<9x32xf32>
    %53 = tpu.matmul %52, %9, %cst_46 {dimension_numbers = #tpu.dot_dimension_numbers<[1], [0], [0], [1], [0, 0, 1, 1], [], []>} : vector<9x64xbf16>, vector<64x32xbf16>, vector<9x32xf32> -> vector<9x32xf32>
    %54 = arith.truncf %53 : vector<9x32xf32> to vector<9x32xbf16>
    %c5_47 = arith.constant 5 : index
    %c0_48 = arith.constant 0 : index
    %c0_49 = arith.constant 0 : index
    %55 = vector.load %arg5[%c5_47, %c0_48, %c0_49] : memref<16x32x64xbf16, #tpu.memory_space<vmem>>, vector<1x32x64xbf16>
    %56 = vector.shape_cast %55 : vector<1x32x64xbf16> to vector<32x64xbf16>
    %cst_50 = arith.constant dense<0.000000e+00> : vector<9x64xf32>
    %57 = tpu.matmul %54, %56, %cst_50 {dimension_numbers = #tpu.dot_dimension_numbers<[1], [0], [0], [1], [0, 0, 1, 1], [], []>} : vector<9x32xbf16>, vector<32x64xbf16>, vector<9x64xf32> -> vector<9x64xf32>
    %58 = arith.addf %50, %57 : vector<9x64xf32>
    %c6 = arith.constant 6 : index
    %c0_51 = arith.constant 0 : index
    %c0_52 = arith.constant 0 : index
    %59 = vector.load %arg4[%c6, %c0_51, %c0_52] : memref<16x9x64xbf16, #tpu.memory_space<vmem>>, vector<1x9x64xbf16>
    %60 = vector.shape_cast %59 : vector<1x9x64xbf16> to vector<9x64xbf16>
    %cst_53 = arith.constant dense<0.000000e+00> : vector<9x32xf32>
    %61 = tpu.matmul %60, %9, %cst_53 {dimension_numbers = #tpu.dot_dimension_numbers<[1], [0], [0], [1], [0, 0, 1, 1], [], []>} : vector<9x64xbf16>, vector<64x32xbf16>, vector<9x32xf32> -> vector<9x32xf32>
    %62 = arith.truncf %61 : vector<9x32xf32> to vector<9x32xbf16>
    %c6_54 = arith.constant 6 : index
    %c0_55 = arith.constant 0 : index
    %c0_56 = arith.constant 0 : index
    %63 = vector.load %arg5[%c6_54, %c0_55, %c0_56] : memref<16x32x64xbf16, #tpu.memory_space<vmem>>, vector<1x32x64xbf16>
    %64 = vector.shape_cast %63 : vector<1x32x64xbf16> to vector<32x64xbf16>
    %cst_57 = arith.constant dense<0.000000e+00> : vector<9x64xf32>
    %65 = tpu.matmul %62, %64, %cst_57 {dimension_numbers = #tpu.dot_dimension_numbers<[1], [0], [0], [1], [0, 0, 1, 1], [], []>} : vector<9x32xbf16>, vector<32x64xbf16>, vector<9x64xf32> -> vector<9x64xf32>
    %66 = arith.addf %58, %65 : vector<9x64xf32>
    %c7 = arith.constant 7 : index
    %c0_58 = arith.constant 0 : index
    %c0_59 = arith.constant 0 : index
    %67 = vector.load %arg4[%c7, %c0_58, %c0_59] : memref<16x9x64xbf16, #tpu.memory_space<vmem>>, vector<1x9x64xbf16>
    %68 = vector.shape_cast %67 : vector<1x9x64xbf16> to vector<9x64xbf16>
    %cst_60 = arith.constant dense<0.000000e+00> : vector<9x32xf32>
    %69 = tpu.matmul %68, %9, %cst_60 {dimension_numbers = #tpu.dot_dimension_numbers<[1], [0], [0], [1], [0, 0, 1, 1], [], []>} : vector<9x64xbf16>, vector<64x32xbf16>, vector<9x32xf32> -> vector<9x32xf32>
    %70 = arith.truncf %69 : vector<9x32xf32> to vector<9x32xbf16>
    %c7_61 = arith.constant 7 : index
    %c0_62 = arith.constant 0 : index
    %c0_63 = arith.constant 0 : index
    %71 = vector.load %arg5[%c7_61, %c0_62, %c0_63] : memref<16x32x64xbf16, #tpu.memory_space<vmem>>, vector<1x32x64xbf16>
    %72 = vector.shape_cast %71 : vector<1x32x64xbf16> to vector<32x64xbf16>
    %cst_64 = arith.constant dense<0.000000e+00> : vector<9x64xf32>
    %73 = tpu.matmul %70, %72, %cst_64 {dimension_numbers = #tpu.dot_dimension_numbers<[1], [0], [0], [1], [0, 0, 1, 1], [], []>} : vector<9x32xbf16>, vector<32x64xbf16>, vector<9x64xf32> -> vector<9x64xf32>
    %74 = arith.addf %66, %73 : vector<9x64xf32>
    %c8 = arith.constant 8 : index
    %c0_65 = arith.constant 0 : index
    %c0_66 = arith.constant 0 : index
    %75 = vector.load %arg4[%c8, %c0_65, %c0_66] : memref<16x9x64xbf16, #tpu.memory_space<vmem>>, vector<1x9x64xbf16>
    %76 = vector.shape_cast %75 : vector<1x9x64xbf16> to vector<9x64xbf16>
    %cst_67 = arith.constant dense<0.000000e+00> : vector<9x32xf32>
    %77 = tpu.matmul %76, %9, %cst_67 {dimension_numbers = #tpu.dot_dimension_numbers<[1], [0], [0], [1], [0, 0, 1, 1], [], []>} : vector<9x64xbf16>, vector<64x32xbf16>, vector<9x32xf32> -> vector<9x32xf32>
    %78 = arith.truncf %77 : vector<9x32xf32> to vector<9x32xbf16>
    %c8_68 = arith.constant 8 : index
    %c0_69 = arith.constant 0 : index
    %c0_70 = arith.constant 0 : index
    %79 = vector.load %arg5[%c8_68, %c0_69, %c0_70] : memref<16x32x64xbf16, #tpu.memory_space<vmem>>, vector<1x32x64xbf16>
    %80 = vector.shape_cast %79 : vector<1x32x64xbf16> to vector<32x64xbf16>
    %cst_71 = arith.constant dense<0.000000e+00> : vector<9x64xf32>
    %81 = tpu.matmul %78, %80, %cst_71 {dimension_numbers = #tpu.dot_dimension_numbers<[1], [0], [0], [1], [0, 0, 1, 1], [], []>} : vector<9x32xbf16>, vector<32x64xbf16>, vector<9x64xf32> -> vector<9x64xf32>
    %82 = arith.addf %74, %81 : vector<9x64xf32>
    %c9 = arith.constant 9 : index
    %c0_72 = arith.constant 0 : index
    %c0_73 = arith.constant 0 : index
    %83 = vector.load %arg4[%c9, %c0_72, %c0_73] : memref<16x9x64xbf16, #tpu.memory_space<vmem>>, vector<1x9x64xbf16>
    %84 = vector.shape_cast %83 : vector<1x9x64xbf16> to vector<9x64xbf16>
    %cst_74 = arith.constant dense<0.000000e+00> : vector<9x32xf32>
    %85 = tpu.matmul %84, %9, %cst_74 {dimension_numbers = #tpu.dot_dimension_numbers<[1], [0], [0], [1], [0, 0, 1, 1], [], []>} : vector<9x64xbf16>, vector<64x32xbf16>, vector<9x32xf32> -> vector<9x32xf32>
    %86 = arith.truncf %85 : vector<9x32xf32> to vector<9x32xbf16>
    %c9_75 = arith.constant 9 : index
    %c0_76 = arith.constant 0 : index
    %c0_77 = arith.constant 0 : index
    %87 = vector.load %arg5[%c9_75, %c0_76, %c0_77] : memref<16x32x64xbf16, #tpu.memory_space<vmem>>, vector<1x32x64xbf16>
    %88 = vector.shape_cast %87 : vector<1x32x64xbf16> to vector<32x64xbf16>
    %cst_78 = arith.constant dense<0.000000e+00> : vector<9x64xf32>
    %89 = tpu.matmul %86, %88, %cst_78 {dimension_numbers = #tpu.dot_dimension_numbers<[1], [0], [0], [1], [0, 0, 1, 1], [], []>} : vector<9x32xbf16>, vector<32x64xbf16>, vector<9x64xf32> -> vector<9x64xf32>
    %90 = arith.addf %82, %89 : vector<9x64xf32>
    %c10 = arith.constant 10 : index
    %c0_79 = arith.constant 0 : index
    %c0_80 = arith.constant 0 : index
    %91 = vector.load %arg4[%c10, %c0_79, %c0_80] : memref<16x9x64xbf16, #tpu.memory_space<vmem>>, vector<1x9x64xbf16>
    %92 = vector.shape_cast %91 : vector<1x9x64xbf16> to vector<9x64xbf16>
    %cst_81 = arith.constant dense<0.000000e+00> : vector<9x32xf32>
    %93 = tpu.matmul %92, %9, %cst_81 {dimension_numbers = #tpu.dot_dimension_numbers<[1], [0], [0], [1], [0, 0, 1, 1], [], []>} : vector<9x64xbf16>, vector<64x32xbf16>, vector<9x32xf32> -> vector<9x32xf32>
    %94 = arith.truncf %93 : vector<9x32xf32> to vector<9x32xbf16>
    %c10_82 = arith.constant 10 : index
    %c0_83 = arith.constant 0 : index
    %c0_84 = arith.constant 0 : index
    %95 = vector.load %arg5[%c10_82, %c0_83, %c0_84] : memref<16x32x64xbf16, #tpu.memory_space<vmem>>, vector<1x32x64xbf16>
    %96 = vector.shape_cast %95 : vector<1x32x64xbf16> to vector<32x64xbf16>
    %cst_85 = arith.constant dense<0.000000e+00> : vector<9x64xf32>
    %97 = tpu.matmul %94, %96, %cst_85 {dimension_numbers = #tpu.dot_dimension_numbers<[1], [0], [0], [1], [0, 0, 1, 1], [], []>} : vector<9x32xbf16>, vector<32x64xbf16>, vector<9x64xf32> -> vector<9x64xf32>
    %98 = arith.addf %90, %97 : vector<9x64xf32>
    %c11 = arith.constant 11 : index
    %c0_86 = arith.constant 0 : index
    %c0_87 = arith.constant 0 : index
    %99 = vector.load %arg4[%c11, %c0_86, %c0_87] : memref<16x9x64xbf16, #tpu.memory_space<vmem>>, vector<1x9x64xbf16>
    %100 = vector.shape_cast %99 : vector<1x9x64xbf16> to vector<9x64xbf16>
    %cst_88 = arith.constant dense<0.000000e+00> : vector<9x32xf32>
    %101 = tpu.matmul %100, %9, %cst_88 {dimension_numbers = #tpu.dot_dimension_numbers<[1], [0], [0], [1], [0, 0, 1, 1], [], []>} : vector<9x64xbf16>, vector<64x32xbf16>, vector<9x32xf32> -> vector<9x32xf32>
    %102 = arith.truncf %101 : vector<9x32xf32> to vector<9x32xbf16>
    %c11_89 = arith.constant 11 : index
    %c0_90 = arith.constant 0 : index
    %c0_91 = arith.constant 0 : index
    %103 = vector.load %arg5[%c11_89, %c0_90, %c0_91] : memref<16x32x64xbf16, #tpu.memory_space<vmem>>, vector<1x32x64xbf16>
    %104 = vector.shape_cast %103 : vector<1x32x64xbf16> to vector<32x64xbf16>
    %cst_92 = arith.constant dense<0.000000e+00> : vector<9x64xf32>
    %105 = tpu.matmul %102, %104, %cst_92 {dimension_numbers = #tpu.dot_dimension_numbers<[1], [0], [0], [1], [0, 0, 1, 1], [], []>} : vector<9x32xbf16>, vector<32x64xbf16>, vector<9x64xf32> -> vector<9x64xf32>
    %106 = arith.addf %98, %105 : vector<9x64xf32>
    %c12 = arith.constant 12 : index
    %c0_93 = arith.constant 0 : index
    %c0_94 = arith.constant 0 : index
    %107 = vector.load %arg4[%c12, %c0_93, %c0_94] : memref<16x9x64xbf16, #tpu.memory_space<vmem>>, vector<1x9x64xbf16>
    %108 = vector.shape_cast %107 : vector<1x9x64xbf16> to vector<9x64xbf16>
    %cst_95 = arith.constant dense<0.000000e+00> : vector<9x32xf32>
    %109 = tpu.matmul %108, %9, %cst_95 {dimension_numbers = #tpu.dot_dimension_numbers<[1], [0], [0], [1], [0, 0, 1, 1], [], []>} : vector<9x64xbf16>, vector<64x32xbf16>, vector<9x32xf32> -> vector<9x32xf32>
    %110 = arith.truncf %109 : vector<9x32xf32> to vector<9x32xbf16>
    %c12_96 = arith.constant 12 : index
    %c0_97 = arith.constant 0 : index
    %c0_98 = arith.constant 0 : index
    %111 = vector.load %arg5[%c12_96, %c0_97, %c0_98] : memref<16x32x64xbf16, #tpu.memory_space<vmem>>, vector<1x32x64xbf16>
    %112 = vector.shape_cast %111 : vector<1x32x64xbf16> to vector<32x64xbf16>
    %cst_99 = arith.constant dense<0.000000e+00> : vector<9x64xf32>
    %113 = tpu.matmul %110, %112, %cst_99 {dimension_numbers = #tpu.dot_dimension_numbers<[1], [0], [0], [1], [0, 0, 1, 1], [], []>} : vector<9x32xbf16>, vector<32x64xbf16>, vector<9x64xf32> -> vector<9x64xf32>
    %114 = arith.addf %106, %113 : vector<9x64xf32>
    %c13 = arith.constant 13 : index
    %c0_100 = arith.constant 0 : index
    %c0_101 = arith.constant 0 : index
    %115 = vector.load %arg4[%c13, %c0_100, %c0_101] : memref<16x9x64xbf16, #tpu.memory_space<vmem>>, vector<1x9x64xbf16>
    %116 = vector.shape_cast %115 : vector<1x9x64xbf16> to vector<9x64xbf16>
    %cst_102 = arith.constant dense<0.000000e+00> : vector<9x32xf32>
    %117 = tpu.matmul %116, %9, %cst_102 {dimension_numbers = #tpu.dot_dimension_numbers<[1], [0], [0], [1], [0, 0, 1, 1], [], []>} : vector<9x64xbf16>, vector<64x32xbf16>, vector<9x32xf32> -> vector<9x32xf32>
    %118 = arith.truncf %117 : vector<9x32xf32> to vector<9x32xbf16>
    %c13_103 = arith.constant 13 : index
    %c0_104 = arith.constant 0 : index
    %c0_105 = arith.constant 0 : index
    %119 = vector.load %arg5[%c13_103, %c0_104, %c0_105] : memref<16x32x64xbf16, #tpu.memory_space<vmem>>, vector<1x32x64xbf16>
    %120 = vector.shape_cast %119 : vector<1x32x64xbf16> to vector<32x64xbf16>
    %cst_106 = arith.constant dense<0.000000e+00> : vector<9x64xf32>
    %121 = tpu.matmul %118, %120, %cst_106 {dimension_numbers = #tpu.dot_dimension_numbers<[1], [0], [0], [1], [0, 0, 1, 1], [], []>} : vector<9x32xbf16>, vector<32x64xbf16>, vector<9x64xf32> -> vector<9x64xf32>
    %122 = arith.addf %114, %121 : vector<9x64xf32>
    %c14 = arith.constant 14 : index
    %c0_107 = arith.constant 0 : index
    %c0_108 = arith.constant 0 : index
    %123 = vector.load %arg4[%c14, %c0_107, %c0_108] : memref<16x9x64xbf16, #tpu.memory_space<vmem>>, vector<1x9x64xbf16>
    %124 = vector.shape_cast %123 : vector<1x9x64xbf16> to vector<9x64xbf16>
    %cst_109 = arith.constant dense<0.000000e+00> : vector<9x32xf32>
    %125 = tpu.matmul %124, %9, %cst_109 {dimension_numbers = #tpu.dot_dimension_numbers<[1], [0], [0], [1], [0, 0, 1, 1], [], []>} : vector<9x64xbf16>, vector<64x32xbf16>, vector<9x32xf32> -> vector<9x32xf32>
    %126 = arith.truncf %125 : vector<9x32xf32> to vector<9x32xbf16>
    %c14_110 = arith.constant 14 : index
    %c0_111 = arith.constant 0 : index
    %c0_112 = arith.constant 0 : index
    %127 = vector.load %arg5[%c14_110, %c0_111, %c0_112] : memref<16x32x64xbf16, #tpu.memory_space<vmem>>, vector<1x32x64xbf16>
    %128 = vector.shape_cast %127 : vector<1x32x64xbf16> to vector<32x64xbf16>
    %cst_113 = arith.constant dense<0.000000e+00> : vector<9x64xf32>
    %129 = tpu.matmul %126, %128, %cst_113 {dimension_numbers = #tpu.dot_dimension_numbers<[1], [0], [0], [1], [0, 0, 1, 1], [], []>} : vector<9x32xbf16>, vector<32x64xbf16>, vector<9x64xf32> -> vector<9x64xf32>
    %130 = arith.addf %122, %129 : vector<9x64xf32>
    %c15 = arith.constant 15 : index
    %c0_114 = arith.constant 0 : index
    %c0_115 = arith.constant 0 : index
    %131 = vector.load %arg4[%c15, %c0_114, %c0_115] : memref<16x9x64xbf16, #tpu.memory_space<vmem>>, vector<1x9x64xbf16>
    %132 = vector.shape_cast %131 : vector<1x9x64xbf16> to vector<9x64xbf16>
    %cst_116 = arith.constant dense<0.000000e+00> : vector<9x32xf32>
    %133 = tpu.matmul %132, %9, %cst_116 {dimension_numbers = #tpu.dot_dimension_numbers<[1], [0], [0], [1], [0, 0, 1, 1], [], []>} : vector<9x64xbf16>, vector<64x32xbf16>, vector<9x32xf32> -> vector<9x32xf32>
    %134 = arith.truncf %133 : vector<9x32xf32> to vector<9x32xbf16>
    %c15_117 = arith.constant 15 : index
    %c0_118 = arith.constant 0 : index
    %c0_119 = arith.constant 0 : index
    %135 = vector.load %arg5[%c15_117, %c0_118, %c0_119] : memref<16x32x64xbf16, #tpu.memory_space<vmem>>, vector<1x32x64xbf16>
    %136 = vector.shape_cast %135 : vector<1x32x64xbf16> to vector<32x64xbf16>
    %cst_120 = arith.constant dense<0.000000e+00> : vector<9x64xf32>
    %137 = tpu.matmul %134, %136, %cst_120 {dimension_numbers = #tpu.dot_dimension_numbers<[1], [0], [0], [1], [0, 0, 1, 1], [], []>} : vector<9x32xbf16>, vector<32x64xbf16>, vector<9x64xf32> -> vector<9x64xf32>
    %138 = arith.addf %130, %137 : vector<9x64xf32>
    %c0_121 = arith.constant 0 : index
    %c0_122 = arith.constant 0 : index
    %139 = vector.load %arg6[%c0_121, %c0_122] : memref<1x64xf32, #tpu.memory_space<vmem>>, vector<1x64xf32>
    %140 = vector.broadcast %139 : vector<1x64xf32> to vector<9x64xf32>
    %141 = arith.addf %138, %140 : vector<9x64xf32>
    %cst_123 = arith.constant 0.000000e+00 : f32
    %142 = vector.broadcast %cst_123 : f32 to vector<9x64xf32>
    %143 = arith.maximumf %141, %142 : vector<9x64xf32>
    %144 = arith.truncf %143 : vector<9x64xf32> to vector<9x64xbf16>
    %cst_124 = arith.constant 0.000000e+00 : f32
    %145 = vector.broadcast %cst_124 : f32 to vector<1x64xf32>
    %c0_125 = arith.constant 0 : index
    %c0_126 = arith.constant 0 : index
    %c0_127 = arith.constant 0 : index
    %146 = vector.load %arg7[%c0_125, %c0_126, %c0_127] : memref<9x1x9xbf16, #tpu.memory_space<vmem>>, vector<1x1x9xbf16>
    %147 = vector.shape_cast %146 : vector<1x1x9xbf16> to vector<1x9xbf16>
    %cst_128 = arith.constant dense<0.000000e+00> : vector<1x64xf32>
    %148 = tpu.matmul %147, %144, %cst_128 {dimension_numbers = #tpu.dot_dimension_numbers<[1], [0], [0], [1], [0, 0, 1, 1], [], []>} : vector<1x9xbf16>, vector<9x64xbf16>, vector<1x64xf32> -> vector<1x64xf32>
    %149 = arith.truncf %148 : vector<1x64xf32> to vector<1x64xbf16>
    %c0_129 = arith.constant 0 : index
    %c0_130 = arith.constant 0 : index
    %c0_131 = arith.constant 0 : index
    %150 = vector.load %arg8[%c0_129, %c0_130, %c0_131] : memref<9x64x64xbf16, #tpu.memory_space<vmem>>, vector<1x64x64xbf16>
    %151 = vector.shape_cast %150 : vector<1x64x64xbf16> to vector<64x64xbf16>
    %cst_132 = arith.constant dense<0.000000e+00> : vector<1x64xf32>
    %152 = tpu.matmul %149, %151, %cst_132 {dimension_numbers = #tpu.dot_dimension_numbers<[1], [0], [0], [1], [0, 0, 1, 1], [], []>} : vector<1x64xbf16>, vector<64x64xbf16>, vector<1x64xf32> -> vector<1x64xf32>
    %153 = arith.addf %145, %152 : vector<1x64xf32>
    %c1_133 = arith.constant 1 : index
    %c0_134 = arith.constant 0 : index
    %c0_135 = arith.constant 0 : index
    %154 = vector.load %arg7[%c1_133, %c0_134, %c0_135] : memref<9x1x9xbf16, #tpu.memory_space<vmem>>, vector<1x1x9xbf16>
    %155 = vector.shape_cast %154 : vector<1x1x9xbf16> to vector<1x9xbf16>
    %cst_136 = arith.constant dense<0.000000e+00> : vector<1x64xf32>
    %156 = tpu.matmul %155, %144, %cst_136 {dimension_numbers = #tpu.dot_dimension_numbers<[1], [0], [0], [1], [0, 0, 1, 1], [], []>} : vector<1x9xbf16>, vector<9x64xbf16>, vector<1x64xf32> -> vector<1x64xf32>
    %157 = arith.truncf %156 : vector<1x64xf32> to vector<1x64xbf16>
    %c1_137 = arith.constant 1 : index
    %c0_138 = arith.constant 0 : index
    %c0_139 = arith.constant 0 : index
    %158 = vector.load %arg8[%c1_137, %c0_138, %c0_139] : memref<9x64x64xbf16, #tpu.memory_space<vmem>>, vector<1x64x64xbf16>
    %159 = vector.shape_cast %158 : vector<1x64x64xbf16> to vector<64x64xbf16>
    %cst_140 = arith.constant dense<0.000000e+00> : vector<1x64xf32>
    %160 = tpu.matmul %157, %159, %cst_140 {dimension_numbers = #tpu.dot_dimension_numbers<[1], [0], [0], [1], [0, 0, 1, 1], [], []>} : vector<1x64xbf16>, vector<64x64xbf16>, vector<1x64xf32> -> vector<1x64xf32>
    %161 = arith.addf %153, %160 : vector<1x64xf32>
    %c2_141 = arith.constant 2 : index
    %c0_142 = arith.constant 0 : index
    %c0_143 = arith.constant 0 : index
    %162 = vector.load %arg7[%c2_141, %c0_142, %c0_143] : memref<9x1x9xbf16, #tpu.memory_space<vmem>>, vector<1x1x9xbf16>
    %163 = vector.shape_cast %162 : vector<1x1x9xbf16> to vector<1x9xbf16>
    %cst_144 = arith.constant dense<0.000000e+00> : vector<1x64xf32>
    %164 = tpu.matmul %163, %144, %cst_144 {dimension_numbers = #tpu.dot_dimension_numbers<[1], [0], [0], [1], [0, 0, 1, 1], [], []>} : vector<1x9xbf16>, vector<9x64xbf16>, vector<1x64xf32> -> vector<1x64xf32>
    %165 = arith.truncf %164 : vector<1x64xf32> to vector<1x64xbf16>
    %c2_145 = arith.constant 2 : index
    %c0_146 = arith.constant 0 : index
    %c0_147 = arith.constant 0 : index
    %166 = vector.load %arg8[%c2_145, %c0_146, %c0_147] : memref<9x64x64xbf16, #tpu.memory_space<vmem>>, vector<1x64x64xbf16>
    %167 = vector.shape_cast %166 : vector<1x64x64xbf16> to vector<64x64xbf16>
    %cst_148 = arith.constant dense<0.000000e+00> : vector<1x64xf32>
    %168 = tpu.matmul %165, %167, %cst_148 {dimension_numbers = #tpu.dot_dimension_numbers<[1], [0], [0], [1], [0, 0, 1, 1], [], []>} : vector<1x64xbf16>, vector<64x64xbf16>, vector<1x64xf32> -> vector<1x64xf32>
    %169 = arith.addf %161, %168 : vector<1x64xf32>
    %c3_149 = arith.constant 3 : index
    %c0_150 = arith.constant 0 : index
    %c0_151 = arith.constant 0 : index
    %170 = vector.load %arg7[%c3_149, %c0_150, %c0_151] : memref<9x1x9xbf16, #tpu.memory_space<vmem>>, vector<1x1x9xbf16>
    %171 = vector.shape_cast %170 : vector<1x1x9xbf16> to vector<1x9xbf16>
    %cst_152 = arith.constant dense<0.000000e+00> : vector<1x64xf32>
    %172 = tpu.matmul %171, %144, %cst_152 {dimension_numbers = #tpu.dot_dimension_numbers<[1], [0], [0], [1], [0, 0, 1, 1], [], []>} : vector<1x9xbf16>, vector<9x64xbf16>, vector<1x64xf32> -> vector<1x64xf32>
    %173 = arith.truncf %172 : vector<1x64xf32> to vector<1x64xbf16>
    %c3_153 = arith.constant 3 : index
    %c0_154 = arith.constant 0 : index
    %c0_155 = arith.constant 0 : index
    %174 = vector.load %arg8[%c3_153, %c0_154, %c0_155] : memref<9x64x64xbf16, #tpu.memory_space<vmem>>, vector<1x64x64xbf16>
    %175 = vector.shape_cast %174 : vector<1x64x64xbf16> to vector<64x64xbf16>
    %cst_156 = arith.constant dense<0.000000e+00> : vector<1x64xf32>
    %176 = tpu.matmul %173, %175, %cst_156 {dimension_numbers = #tpu.dot_dimension_numbers<[1], [0], [0], [1], [0, 0, 1, 1], [], []>} : vector<1x64xbf16>, vector<64x64xbf16>, vector<1x64xf32> -> vector<1x64xf32>
    %177 = arith.addf %169, %176 : vector<1x64xf32>
    %c4_157 = arith.constant 4 : index
    %c0_158 = arith.constant 0 : index
    %c0_159 = arith.constant 0 : index
    %178 = vector.load %arg7[%c4_157, %c0_158, %c0_159] : memref<9x1x9xbf16, #tpu.memory_space<vmem>>, vector<1x1x9xbf16>
    %179 = vector.shape_cast %178 : vector<1x1x9xbf16> to vector<1x9xbf16>
    %cst_160 = arith.constant dense<0.000000e+00> : vector<1x64xf32>
    %180 = tpu.matmul %179, %144, %cst_160 {dimension_numbers = #tpu.dot_dimension_numbers<[1], [0], [0], [1], [0, 0, 1, 1], [], []>} : vector<1x9xbf16>, vector<9x64xbf16>, vector<1x64xf32> -> vector<1x64xf32>
    %181 = arith.truncf %180 : vector<1x64xf32> to vector<1x64xbf16>
    %c4_161 = arith.constant 4 : index
    %c0_162 = arith.constant 0 : index
    %c0_163 = arith.constant 0 : index
    %182 = vector.load %arg8[%c4_161, %c0_162, %c0_163] : memref<9x64x64xbf16, #tpu.memory_space<vmem>>, vector<1x64x64xbf16>
    %183 = vector.shape_cast %182 : vector<1x64x64xbf16> to vector<64x64xbf16>
    %cst_164 = arith.constant dense<0.000000e+00> : vector<1x64xf32>
    %184 = tpu.matmul %181, %183, %cst_164 {dimension_numbers = #tpu.dot_dimension_numbers<[1], [0], [0], [1], [0, 0, 1, 1], [], []>} : vector<1x64xbf16>, vector<64x64xbf16>, vector<1x64xf32> -> vector<1x64xf32>
    %185 = arith.addf %177, %184 : vector<1x64xf32>
    %c5_165 = arith.constant 5 : index
    %c0_166 = arith.constant 0 : index
    %c0_167 = arith.constant 0 : index
    %186 = vector.load %arg7[%c5_165, %c0_166, %c0_167] : memref<9x1x9xbf16, #tpu.memory_space<vmem>>, vector<1x1x9xbf16>
    %187 = vector.shape_cast %186 : vector<1x1x9xbf16> to vector<1x9xbf16>
    %cst_168 = arith.constant dense<0.000000e+00> : vector<1x64xf32>
    %188 = tpu.matmul %187, %144, %cst_168 {dimension_numbers = #tpu.dot_dimension_numbers<[1], [0], [0], [1], [0, 0, 1, 1], [], []>} : vector<1x9xbf16>, vector<9x64xbf16>, vector<1x64xf32> -> vector<1x64xf32>
    %189 = arith.truncf %188 : vector<1x64xf32> to vector<1x64xbf16>
    %c5_169 = arith.constant 5 : index
    %c0_170 = arith.constant 0 : index
    %c0_171 = arith.constant 0 : index
    %190 = vector.load %arg8[%c5_169, %c0_170, %c0_171] : memref<9x64x64xbf16, #tpu.memory_space<vmem>>, vector<1x64x64xbf16>
    %191 = vector.shape_cast %190 : vector<1x64x64xbf16> to vector<64x64xbf16>
    %cst_172 = arith.constant dense<0.000000e+00> : vector<1x64xf32>
    %192 = tpu.matmul %189, %191, %cst_172 {dimension_numbers = #tpu.dot_dimension_numbers<[1], [0], [0], [1], [0, 0, 1, 1], [], []>} : vector<1x64xbf16>, vector<64x64xbf16>, vector<1x64xf32> -> vector<1x64xf32>
    %193 = arith.addf %185, %192 : vector<1x64xf32>
    %c6_173 = arith.constant 6 : index
    %c0_174 = arith.constant 0 : index
    %c0_175 = arith.constant 0 : index
    %194 = vector.load %arg7[%c6_173, %c0_174, %c0_175] : memref<9x1x9xbf16, #tpu.memory_space<vmem>>, vector<1x1x9xbf16>
    %195 = vector.shape_cast %194 : vector<1x1x9xbf16> to vector<1x9xbf16>
    %cst_176 = arith.constant dense<0.000000e+00> : vector<1x64xf32>
    %196 = tpu.matmul %195, %144, %cst_176 {dimension_numbers = #tpu.dot_dimension_numbers<[1], [0], [0], [1], [0, 0, 1, 1], [], []>} : vector<1x9xbf16>, vector<9x64xbf16>, vector<1x64xf32> -> vector<1x64xf32>
    %197 = arith.truncf %196 : vector<1x64xf32> to vector<1x64xbf16>
    %c6_177 = arith.constant 6 : index
    %c0_178 = arith.constant 0 : index
    %c0_179 = arith.constant 0 : index
    %198 = vector.load %arg8[%c6_177, %c0_178, %c0_179] : memref<9x64x64xbf16, #tpu.memory_space<vmem>>, vector<1x64x64xbf16>
    %199 = vector.shape_cast %198 : vector<1x64x64xbf16> to vector<64x64xbf16>
    %cst_180 = arith.constant dense<0.000000e+00> : vector<1x64xf32>
    %200 = tpu.matmul %197, %199, %cst_180 {dimension_numbers = #tpu.dot_dimension_numbers<[1], [0], [0], [1], [0, 0, 1, 1], [], []>} : vector<1x64xbf16>, vector<64x64xbf16>, vector<1x64xf32> -> vector<1x64xf32>
    %201 = arith.addf %193, %200 : vector<1x64xf32>
    %c7_181 = arith.constant 7 : index
    %c0_182 = arith.constant 0 : index
    %c0_183 = arith.constant 0 : index
    %202 = vector.load %arg7[%c7_181, %c0_182, %c0_183] : memref<9x1x9xbf16, #tpu.memory_space<vmem>>, vector<1x1x9xbf16>
    %203 = vector.shape_cast %202 : vector<1x1x9xbf16> to vector<1x9xbf16>
    %cst_184 = arith.constant dense<0.000000e+00> : vector<1x64xf32>
    %204 = tpu.matmul %203, %144, %cst_184 {dimension_numbers = #tpu.dot_dimension_numbers<[1], [0], [0], [1], [0, 0, 1, 1], [], []>} : vector<1x9xbf16>, vector<9x64xbf16>, vector<1x64xf32> -> vector<1x64xf32>
    %205 = arith.truncf %204 : vector<1x64xf32> to vector<1x64xbf16>
    %c7_185 = arith.constant 7 : index
    %c0_186 = arith.constant 0 : index
    %c0_187 = arith.constant 0 : index
    %206 = vector.load %arg8[%c7_185, %c0_186, %c0_187] : memref<9x64x64xbf16, #tpu.memory_space<vmem>>, vector<1x64x64xbf16>
    %207 = vector.shape_cast %206 : vector<1x64x64xbf16> to vector<64x64xbf16>
    %cst_188 = arith.constant dense<0.000000e+00> : vector<1x64xf32>
    %208 = tpu.matmul %205, %207, %cst_188 {dimension_numbers = #tpu.dot_dimension_numbers<[1], [0], [0], [1], [0, 0, 1, 1], [], []>} : vector<1x64xbf16>, vector<64x64xbf16>, vector<1x64xf32> -> vector<1x64xf32>
    %209 = arith.addf %201, %208 : vector<1x64xf32>
    %c8_189 = arith.constant 8 : index
    %c0_190 = arith.constant 0 : index
    %c0_191 = arith.constant 0 : index
    %210 = vector.load %arg7[%c8_189, %c0_190, %c0_191] : memref<9x1x9xbf16, #tpu.memory_space<vmem>>, vector<1x1x9xbf16>
    %211 = vector.shape_cast %210 : vector<1x1x9xbf16> to vector<1x9xbf16>
    %cst_192 = arith.constant dense<0.000000e+00> : vector<1x64xf32>
    %212 = tpu.matmul %211, %144, %cst_192 {dimension_numbers = #tpu.dot_dimension_numbers<[1], [0], [0], [1], [0, 0, 1, 1], [], []>} : vector<1x9xbf16>, vector<9x64xbf16>, vector<1x64xf32> -> vector<1x64xf32>
    %213 = arith.truncf %212 : vector<1x64xf32> to vector<1x64xbf16>
    %c8_193 = arith.constant 8 : index
    %c0_194 = arith.constant 0 : index
    %c0_195 = arith.constant 0 : index
    %214 = vector.load %arg8[%c8_193, %c0_194, %c0_195] : memref<9x64x64xbf16, #tpu.memory_space<vmem>>, vector<1x64x64xbf16>
    %215 = vector.shape_cast %214 : vector<1x64x64xbf16> to vector<64x64xbf16>
    %cst_196 = arith.constant dense<0.000000e+00> : vector<1x64xf32>
    %216 = tpu.matmul %213, %215, %cst_196 {dimension_numbers = #tpu.dot_dimension_numbers<[1], [0], [0], [1], [0, 0, 1, 1], [], []>} : vector<1x64xbf16>, vector<64x64xbf16>, vector<1x64xf32> -> vector<1x64xf32>
    %217 = arith.addf %209, %216 : vector<1x64xf32>
    %c0_197 = arith.constant 0 : index
    %c0_198 = arith.constant 0 : index
    %218 = vector.load %arg9[%c0_197, %c0_198] : memref<1x64xf32, #tpu.memory_space<vmem>>, vector<1x64xf32>
    %219 = arith.addf %217, %218 : vector<1x64xf32>
    %cst_199 = arith.constant 0.000000e+00 : f32
    %220 = vector.broadcast %cst_199 : f32 to vector<1x64xf32>
    %221 = arith.maximumf %219, %220 : vector<1x64xf32>
    %222 = arith.truncf %221 : vector<1x64xf32> to vector<1x64xbf16>
    %cst_200 = arith.constant 0.000000e+00 : f32
    %223 = vector.broadcast %cst_200 : f32 to vector<1x512xf32>
    %c0_201 = arith.constant 0 : index
    %c0_202 = arith.constant 0 : index
    %c0_203 = arith.constant 0 : index
    %224 = vector.load %arg10[%c0_201, %c0_202, %c0_203] : memref<1x64x512xbf16, #tpu.memory_space<vmem>>, vector<1x64x512xbf16>
    %225 = vector.shape_cast %224 : vector<1x64x512xbf16> to vector<64x512xbf16>
    %cst_204 = arith.constant dense<0.000000e+00> : vector<1x512xf32>
    %226 = tpu.matmul %222, %225, %cst_204 {dimension_numbers = #tpu.dot_dimension_numbers<[1], [0], [0], [1], [0, 0, 1, 1], [], []>} : vector<1x64xbf16>, vector<64x512xbf16>, vector<1x512xf32> -> vector<1x512xf32>
    %227 = arith.addf %223, %226 : vector<1x512xf32>
    %c0_205 = arith.constant 0 : index
    %c0_206 = arith.constant 0 : index
    %228 = vector.load %arg11[%c0_205, %c0_206] : memref<1x512xf32, #tpu.memory_space<vmem>>, vector<1x512xf32>
    %229 = arith.addf %227, %228 : vector<1x512xf32>
    %cst_207 = arith.constant 0.000000e+00 : f32
    %230 = vector.broadcast %cst_207 : f32 to vector<1x512xf32>
    %231 = arith.maximumf %229, %230 : vector<1x512xf32>
    %232 = arith.truncf %231 : vector<1x512xf32> to vector<1x512xbf16>
    %c0_208 = arith.constant 0 : index
    %c0_209 = arith.constant 0 : index
    %233 = vector.load %arg12[%c0_208, %c0_209] : memref<512x6xbf16, #tpu.memory_space<vmem>>, vector<512x6xbf16>
    %cst_210 = arith.constant dense<0.000000e+00> : vector<1x6xf32>
    %234 = tpu.matmul %232, %233, %cst_210 {dimension_numbers = #tpu.dot_dimension_numbers<[1], [0], [0], [1], [0, 0, 1, 1], [], []>} : vector<1x512xbf16>, vector<512x6xbf16>, vector<1x6xf32> -> vector<1x6xf32>
    %c0_211 = arith.constant 0 : index
    %c0_212 = arith.constant 0 : index
    %235 = vector.load %arg13[%c0_211, %c0_212] : memref<1x6xf32, #tpu.memory_space<vmem>>, vector<1x6xf32>
    %236 = arith.addf %234, %235 : vector<1x6xf32>
    %c0_213 = arith.constant 0 : index
    %c0_214 = arith.constant 0 : index
    %c0_215 = arith.constant 0 : index
    %237 = vector.load %arg14[%c0_213, %c0_214, %c0_215] : memref<1x1x6xf32, #tpu.memory_space<vmem>>, vector<1x1x6xf32>
    %238 = vector.shape_cast %237 : vector<1x1x6xf32> to vector<1x6xf32>
    %239 = vector.shape_cast %236 : vector<1x6xf32> to vector<1x1x6xf32>
    tpu.vector_store %arg14[%c0_213, %c0_214, %c0_215], %239 {strides = array<i32>} : memref<1x1x6xf32, #tpu.memory_space<vmem>>, vector<1x1x6xf32>,
    return
  }
  func.func @transform_0(%arg0: i32) -> (i32, i32, i32) {
    %c0_i32 = arith.constant 0 : i32
    %c0_i32_0 = arith.constant 0 : i32
    %c0_i32_1 = arith.constant 0 : i32
    return %arg0, %c0_i32, %c0_i32_0 : i32, i32, i32
  }
  func.func @transform_1(%arg0: i32) -> (i32, i32) {
    %c0_i32 = arith.constant 0 : i32
    %c0_i32_0 = arith.constant 0 : i32
    %c0_i32_1 = arith.constant 0 : i32
    return %c0_i32, %c0_i32_0 : i32, i32
  }
  func.func @transform_2(%arg0: i32) -> (i32, i32) {
    %c0_i32 = arith.constant 0 : i32
    %c0_i32_0 = arith.constant 0 : i32
    %c0_i32_1 = arith.constant 0 : i32
    return %c0_i32, %c0_i32_0 : i32, i32
  }
  func.func @transform_3(%arg0: i32) -> (i32, i32, i32) {
    %c0_i32 = arith.constant 0 : i32
    %c0_i32_0 = arith.constant 0 : i32
    %c0_i32_1 = arith.constant 0 : i32
    %c0_i32_2 = arith.constant 0 : i32
    return %c0_i32, %c0_i32_0, %c0_i32_1 : i32, i32, i32
  }
  func.func @transform_4(%arg0: i32) -> (i32, i32, i32) {
    %c0_i32 = arith.constant 0 : i32
    %c0_i32_0 = arith.constant 0 : i32
    %c0_i32_1 = arith.constant 0 : i32
    %c0_i32_2 = arith.constant 0 : i32
    return %c0_i32, %c0_i32_0, %c0_i32_1 : i32, i32, i32
  }
  func.func @transform_5(%arg0: i32) -> (i32, i32) {
    %c0_i32 = arith.constant 0 : i32
    %c0_i32_0 = arith.constant 0 : i32
    %c0_i32_1 = arith.constant 0 : i32
    return %c0_i32, %c0_i32_0 : i32, i32
  }
  func.func @transform_6(%arg0: i32) -> (i32, i32, i32) {
    %c0_i32 = arith.constant 0 : i32
    %c0_i32_0 = arith.constant 0 : i32
    %c0_i32_1 = arith.constant 0 : i32
    %c0_i32_2 = arith.constant 0 : i32
    return %c0_i32, %c0_i32_0, %c0_i32_1 : i32, i32, i32
  }
  func.func @transform_7(%arg0: i32) -> (i32, i32, i32) {
    %c0_i32 = arith.constant 0 : i32
    %c0_i32_0 = arith.constant 0 : i32
    %c0_i32_1 = arith.constant 0 : i32
    %c0_i32_2 = arith.constant 0 : i32
    return %c0_i32, %c0_i32_0, %c0_i32_1 : i32, i32, i32
  }
  func.func @transform_8(%arg0: i32) -> (i32, i32) {
    %c0_i32 = arith.constant 0 : i32
    %c0_i32_0 = arith.constant 0 : i32
    %c0_i32_1 = arith.constant 0 : i32
    return %c0_i32, %c0_i32_0 : i32, i32
  }
  func.func @transform_9(%arg0: i32) -> (i32, i32, i32) {
    %c0_i32 = arith.constant 0 : i32
    %c0_i32_0 = arith.constant 0 : i32
    %c0_i32_1 = arith.constant 0 : i32
    %c0_i32_2 = arith.constant 0 : i32
    return %c0_i32, %c0_i32_0, %c0_i32_1 : i32, i32, i32
  }
  func.func @transform_10(%arg0: i32) -> (i32, i32) {
    %c0_i32 = arith.constant 0 : i32
    %c0_i32_0 = arith.constant 0 : i32
    %c0_i32_1 = arith.constant 0 : i32
    return %c0_i32, %c0_i32_0 : i32, i32
  }
  func.func @transform_11(%arg0: i32) -> (i32, i32) {
    %c0_i32 = arith.constant 0 : i32
    %c0_i32_0 = arith.constant 0 : i32
    %c0_i32_1 = arith.constant 0 : i32
    return %c0_i32, %c0_i32_0 : i32, i32
  }
  func.func @transform_12(%arg0: i32) -> (i32, i32) {
    %c0_i32 = arith.constant 0 : i32
    %c0_i32_0 = arith.constant 0 : i32
    %c0_i32_1 = arith.constant 0 : i32
    return %c0_i32, %c0_i32_0 : i32, i32
  }
  func.func @transform_13(%arg0: i32) -> (i32, i32, i32) {
    %c0_i32 = arith.constant 0 : i32
    %c0_i32_0 = arith.constant 0 : i32
    %c0_i32_1 = arith.constant 0 : i32
    return %arg0, %c0_i32, %c0_i32_0 : i32, i32, i32
  }
}

</mosaic_0001>

<bundles_post_ra>
// kernel: torch_convnet_forward.1
= control target key start
LH: loop header
LB: loop body
LE: loop exit
PB: predicated region body
PF: predicated region fallthrough
CT: control target
= control target key end

     0   :  { %18 = vsyncpa [#allocation3], 0  ;;  %s4877_s0 = inlined_call_operand.vmem [shape: bf16[2,64,256], index: 0, kind: input, shape index: {}]   ;;  %s4878_s1 = inlined_call_operand.vmem [shape: bf16[256,32], index: 1, kind: input, shape index: {}]   ;;  %s4879_s2 = inlined_call_operand.vmem [shape: f32[1,32], index: 2, kind: input, shape index: {}]   ;;  %s4880_s3 = inlined_call_operand.vmem [shape: bf16[16,9,64], index: 3, kind: input, shape index: {}]   ;;  %s4881_s4 = inlined_call_operand.vmem [shape: bf16[16,32,64], index: 4, kind: input, shape index: {}]   ;;  %s4882_s5 = inlined_call_operand.vmem [shape: f32[1,64], index: 5, kind: input, shape index: {}]   ;;  %s4883_s6 = inlined_call_operand.vmem [shape: bf16[9,1,9], index: 6, kind: input, shape index: {}]   ;;  %s4884_s7 = inlined_call_operand.vmem [shape: bf16[9,64,64], index: 7, kind: input, shape index: {}]   ;;  %s4885_s8 = inlined_call_operand.vmem [shape: f32[1,64], index: 8, kind: input, shape index: {}]   ;;  %s4886_s9 = inlined_call_operand.vmem [shape: bf16[1,64,512], index: 9, kind: input, shape index: {}]   ;;  %s4887_s10 = inlined_call_operand.vmem [shape: f32[1,512], index: 10, kind: input, shape index: {}]   ;;  %s4888_s11 = inlined_call_operand.vmem [shape: bf16[512,6], index: 11, kind: input, shape index: {}]   ;;  %s4889_s12 = inlined_call_operand.vmem [shape: f32[1,6], index: 12, kind: input, shape index: {}]   ;;  %s4890_s13 = inlined_call_operand.hbm [shape: f32[2,1,6], index: 13, kind: output, shape index: {}]  }
   0x1   :  { %20 = vsyncpa [#allocation3 + $0x1], 0  ;;  %s4045_s25 = smov 0   ;;  %s4047_s26 = smov 0  }
   0x2   :  { %s4049_s27 = smov 0   ;;  %s4051_s28 = smov 0  }
   0x3 LB: > { %4896 = sst [smem:[#allocation5_spill]] %s3960_s25  ;;  %s4066_s29 = sadd.s32 4294967295, %s3972_s28   ;;  %s3972_s28 = sphi %s4051_s28, %s4905_s28   ;;  %s3968_s27 = sphi %s4049_s27, %s4907_s27   ;;  %s3964_s26 = sphi %s4047_s26, %s4909_s26   ;;  %s3960_s25 = sphi %s4045_s25, %s4908_s25  }
   0x4   : > { %4897 = sst [smem:[#allocation6_spill]] %s3968_s27  ;;  %s2863_s30 = sadd.s32 4294967294, %s3972_s28  }
   0x5   : > { %s4070_s14 = sadd.s32 1, %s3972_s28   ;;  %s311_s15 = sadd.s32 1, %s3968_s27 }
   0x6   : > { %4898 = sst [smem:[#allocation7_spill]] %s4070_s14  ;;  %s308_s16 = ssub.s32 %s3972_s28, %s4070_s14 }
   0x7   : > { %p321_p0 = scmp.ne.s32.totalorder %s3968_s27, %s3964_s26  ;;  %p309_p1 = scmp.eq.s32.totalorder %s308_s16, 0 }
   0x8   : > { %p322_p2 = scmp.eq.s32.totalorder %s4066_s29, 1  ;;  %p327_p3 = scmp.ne.s32.totalorder %s3964_s26, %s3960_s25 }
   0x9   : > { %p328_p4 = scmp.eq.s32.totalorder %s2863_s30, 1  ;;  %p2866_p7 = scmp.ge.s32.totalorder %s3972_s28, 1 }
   0xa   : > { %s4081_s17 = scalar_select %p309_p1, %s3968_s27, %s311_s15  }
   0xb   : > { %p4083_p5 = por %p322_p2, %p321_p0  ;;  %p4087_p6 = por %p328_p4, %p327_p3 }
   0xc   : > { %4899 = sst [smem:[#allocation8_spill]] %s4081_s17  ;;  %p390_p8 = scmp.lt.s32.totalorder %s3972_s28, 3 }
   0xd   : > { %s4901_s19 = scalar_select %p4087_p6, 1, 0 }
   0xe   : > { %p391_p9 = pnand %p2866_p7, %p390_p8 }
   0xf   : > { %4902 = sst [smem:[#allocation9_spill]] %s4901_s19  ;;  %p433_p10 = scmp.lt.s32.totalorder (!%p391_p9), %s4066_s29, 1 }
  0x10   : > { %394 = sbr.rel (%p391_p9) target bundleno = 1550 (0x60e), region = 72  ;;  %s431_s15 = sand.u32 (!%p391_p9), 1, %s3964_s26  }
  0x11   : > { %s2804_s17 = scalar_lea.hbm (!%p391_p9), %s4890_s13, %s4066_s29  ;;  %s2796_s27 = scalar_lea.sflag (!%p391_p9), [#allocation3], %s431_s15 }
  0x12   : > { %s3930_s24 = scalar_lea.hbm (!%p391_p9), %s4890_s13, 2 }
  0x15   : > { %v3727_v0 = vld [vmem:[%s4878_s1 + $0x38] sm:$0xff]  ;;  %v3726_v2 = vld [vmem:[%s4878_s1 + $0x30] sm:$0xff]  ;;  %v3725_v4 = vld [vmem:[%s4878_s1 + $0x28] sm:$0xff]  ;;  %s434_s21 = scalar_select %p433_p10, %s4066_s29, 1  ;;  %vm696_vm0 = vcmask 523264   ;;  %vm762_vm1 = vcmask 261120  }
  0x16   : > { %v3735_v1 = vld [vmem:[%s4878_s1 + $0x78] sm:$0xff]  ;;  %619 = vmatpush.bf16.msra.mxu0 %v3727_v0  ;;  %v3734_v3 = vld [vmem:[%s4878_s1 + $0x70] sm:$0xff]  ;;  %v3733_v5 = vld [vmem:[%s4878_s1 + $0x68] sm:$0xff]  ;;  %vm1691_vm2 = vcmask 1043456   ;;  %vm1692_vm3 = vcmask 1044480   ;;  %vm1687_vm4 = vcmask 72704  }
  0x17   : > { %648 = vmatpush.bf16.msra.mxu1 %v3735_v1  ;;  %v3724_v6 = vld [vmem:[%s4878_s1 + $0x20] sm:$0xff]  ;;  %v3723_v8 = vld [vmem:[%s4878_s1 + $0x18] sm:$0xff]  ;;  %v3722_v10 = vld [vmem:[%s4878_s1 + $0x10] sm:$0xff]  ;;  %s3711_s30 = sshll.u32 %s434_s21, 6  ;;  %s2808_s21 = sshll.u32 %s2804_s17, 4  ;;  %vm2793_vm5 = vcmask 40960   ;;  %s2809_s21 = int_to_ptr.hbm [resolvable:$true] %s2808_s21 }
  0x18   : > { %v3732_v7 = vld [vmem:[%s4878_s1 + $0x60] sm:$0xff]  ;;  %v3731_v9 = vld [vmem:[%s4878_s1 + $0x58] sm:$0xff]  ;;  %v3730_v11 = vld [vmem:[%s4878_s1 + $0x50] sm:$0xff]  ;;  %s4140_s22 = scalar_lea.vmem %s4877_s0, %s3711_s30  ;;  %s3924_s25 = sshra.s32 %s2809_s21, 4  ;;  %s3925_s25 = int_to_ptr.hbm [resolvable:$true] %s3924_s25 }
  0x19   : > { %v3721_v12 = vld [vmem:[%s4878_s1 + $0x8] sm:$0xff]  ;;  %v3720_v14 = vld [vmem:[%s4878_s1] sm:$0xff]  ;;  %v2879_v22 = vld [vmem:[%s4140_s22 + $0x10] sm:$0xf]  ;;  %s3926_s14 = scalar_lea.hbm %s3925_s25, 1  ;;  %p3931_p0 = scmp.lt.s32.totalorder %s3925_s25, %s4890_s13 }
  0x1a   : > { %620 = vmatpush.bf16.msra.mxu0 %v3726_v2  ;;  %v3729_v13 = vld [vmem:[%s4878_s1 + $0x48] sm:$0xff]  ;;  %v3728_v15 = vld [vmem:[%s4878_s1 + $0x40] sm:$0xff]  ;;  %v3715_v23 = vld [vmem:[%s4140_s22 + $0x14] sm:$0xf0]  ;;  %p3927_p11 = scmp.ne.s32.totalorder %s3925_s25, %s3926_s14  ;;  %p3932_p1 = scmp.lt.s32.totalorder %s3930_s24, %s3926_s14 }
  0x1b   : > { %649 = vmatpush.bf16.msra.mxu1 %v3734_v3  ;;  %v2871_v16 = vld [vmem:[%s4140_s22] sm:$0xf]  ;;  %v3713_v17 = vld [vmem:[%s4140_s22 + $0x4] sm:$0xf0]  ;;  %v3712_v18 = vld [vmem:[%s4140_s22 + $0x4] sm:$0xf]  ;;  %v2880_v26 = vor.u32 %v3715_v23, %v2879_v22 }
  0x1c   : > { %v2873_v19 = vld [vmem:[%s4140_s22 + $0x8] sm:$0xf0]  ;;  %v2872_v20 = vor.u32 %v3713_v17, %v2871_v16  ;;  %v3714_v24 = vld [vmem:[%s4140_s22 + $0x14] sm:$0xf]  ;;  %v2881_v25 = vld [vmem:[%s4140_s22 + $0x18] sm:$0xf0]  ;;  %p3928_p12 = pnand %p3927_p11, %p4083_p5  ;;  %p3933_p2 = por %p3932_p1, %p3931_p0 }
  0x1d   : > { %v2876_v21 = vor.u32 %v3712_v18, %v2873_v19  ;;  %v2884_v27 = vor.u32 %v3714_v24, %v2881_v25  ;;  %v2887_v28 = vld [vmem:[%s4140_s22 + $0x20] sm:$0xf]  ;;  %v3717_v29 = vld [vmem:[%s4140_s22 + $0x24] sm:$0xf0]  ;;  %v3716_v30 = vld [vmem:[%s4140_s22 + $0x24] sm:$0xf] }
  0x1e   : > { %621 = vmatpush.bf16.msra.mxu0 %v3725_v4  ;;  %v2889_v31 = vld [vmem:[%s4140_s22 + $0x28] sm:$0xf0]  ;;  %v2888_v32 = vor.u32 %v3717_v29, %v2887_v28  ;;  %v2895_v34 = vld [vmem:[%s4140_s22 + $0x30] sm:$0xf]  ;;  %v3719_v35 = vld [vmem:[%s4140_s22 + $0x34] sm:$0xf0]  ;;  %p3929_p13 = pneg %p3928_p12 }
  0x1f   : > { %650 = vmatpush.bf16.msra.mxu1 %v3733_v5  ;;  %v2892_v33 = vor.u32 %v3716_v30, %v2889_v31  ;;  %v3718_v36 = vld [vmem:[%s4140_s22 + $0x34] sm:$0xf]  ;;  %v2897_v37 = vld [vmem:[%s4140_s22 + $0x38] sm:$0xf0]  ;;  %v2896_v38 = vor.u32 %v3719_v35, %v2895_v34  ;;  %v3908_v40 = vld [vmem:[%s4879_s2] ss:$0 sm:$0xff] }
  0x20   : > { %v2900_v39 = vor.u32 %v3718_v36, %v2897_v37  ;;  %v2974_v22 = vld [vmem:[%s4880_s3 + $0x8] sm:$0xf]  ;;  %v3739_v23 = vld [vmem:[%s4880_s3 + $0x8] sm:$0x10]  ;;  %v3741_v24 = vld [vmem:[%s4881_s4 + $0x18] sm:$0xff]  ;;  %s432_s22 = scalar_lea.vmem [#allocation2], %s431_s15  ;;  %p3934_p3 = pnand %p3933_p2, %p3929_p13 }
  0x21   : > { %v3063_v25 = vld [vmem:[%s4880_s3 + $0x28] sm:$0xf]  ;;  %v2975_v29 = vor.u32 %v3739_v23, %v2974_v22  ;;  %v3740_v31 = vld [vmem:[%s4881_s4 + $0x10] sm:$0xff]  ;;  %v3763_v36 = vld [vmem:[%s4880_s3 + $0x48] sm:$0x10]  ;;  %s2806_s23 = sshll.u32 %s432_s22, 4  ;;  %s2807_s23 = int_to_ptr.vmem [resolvable:$true] %s2806_s23 }
  0x22   : > { %622 = vmatpush.bf16.msra.mxu0 %v3724_v6  ;;  %v3143_v35 = vld [vmem:[%s4880_s3 + $0x48] sm:$0xf]  ;;  %v3746_v23 = vld [vmem:[%s4881_s4 + $0x30] sm:$0xff] }
  0x23   : > { %651 = vmatpush.bf16.msra.mxu1 %v3732_v7  ;;  %v3144_v37 = vor.u32 %v3763_v36, %v3143_v35  ;;  %v3758_v36 = vld [vmem:[%s4881_s4 + $0x70] sm:$0xff] }
  0x26   : > { %623 = vmatpush.bf16.msra.mxu0 %v3723_v8 }
  0x27   : > { %652 = vmatpush.bf16.msra.mxu1 %v3731_v9 }
  0x2a   : > { %624 = vmatpush.bf16.msra.mxu0 %v3722_v10 }
  0x2b   : > { %653 = vmatpush.bf16.msra.mxu1 %v3730_v11 }
  0x2e   : > { %625 = vmatpush.bf16.msra.mxu0 %v3721_v12 }
  0x2f   : > { %654 = vmatpush.bf16.msra.mxu1 %v3729_v13 }
  0x32   : > { %626 = vmatpush.bf16.msra.mxu0 %v3720_v14 }
  0x33   : > { %655 = vmatpush.bf16.msra.mxu1 %v3728_v15 }
  0x35   : > { %627 = vmatmul.bf16.vlgmr.msra.gmra.mxu0 %v2872_v20  ;;  %v2967_v20 = vld [vmem:[%s4880_s3] sm:$0xf] }
  0x36   : > { %656 = vmatmul.bf16.vlgmr.msra.gmra.mxu1 %v2876_v21  ;;  %v3736_v21 = vld [vmem:[%s4880_s3] sm:$0x10] }
  0x37   : > { %v2968_v28 = vor.u32 %v3736_v21, %v2967_v20  ;;  %v3747_v20 = vld [vmem:[%s4881_s4 + $0x38] sm:$0xff] }
  0x45   : > { %632 = vmatmul.bf16.gmra.mxu0 %v2880_v26  ;;  %v3751_v26 = vld [vmem:[%s4880_s3 + $0x28] sm:$0x10] }
  0x46   : > { %661 = vmatmul.bf16.gmra.mxu1 %v2884_v27  ;;  %v3064_v30 = vor.u32 %v3751_v26, %v3063_v25  ;;  %v3752_v26 = vld [vmem:[%s4881_s4 + $0x50] sm:$0xff] }
  0x55   : > { %637 = vmatmul.bf16.gmra.mxu0 %v2888_v32  ;;  %v3103_v32 = vld [vmem:[%s4880_s3 + $0x38] sm:$0xf] }
  0x56   : > { %666 = vmatmul.bf16.gmra.mxu1 %v2892_v33  ;;  %v3757_v33 = vld [vmem:[%s4880_s3 + $0x38] sm:$0x10] }
  0x57   : > { %v3104_v34 = vor.u32 %v3757_v33, %v3103_v32  ;;  %v3759_v33 = vld [vmem:[%s4881_s4 + $0x78] sm:$0xff] }
  0x65   : > { %642 = vmatmul.bf16.gmra.mxu0 %v2896_v38  ;;  %v3183_v38 = vld [vmem:[%s4880_s3 + $0x58] sm:$0xf] }
  0x66   : > { %671 = vmatmul.bf16.gmra.mxu1 %v2900_v39  ;;  %v3769_v39 = vld [vmem:[%s4880_s3 + $0x58] sm:$0x10] }
  0xb2   : > { %v628_v41 = vpop.f32.mrf.mxu0 }
  0xb3   : > { %v657_v42 = vpop.f32.mrf.mxu1  ;;  %v629_v43 = vadd.f32 %v3908_v40, %v628_v41  ;;  %v3738_v41 = vld [vmem:[%s4881_s4 + $0x8] sm:$0xff] }
  0xb5   : > { %v658_v44 = vadd.f32 %v657_v42, %v629_v43  ;;  %v3737_v42 = vld [vmem:[%s4881_s4] sm:$0xff] }
  0xb7   : > { %v677_v19 = vmax.f32 %v658_v44, 0.0 }
  0xba   : > { %v630_v45 = vpop.f32.mrf.mxu0 }
  0xbb   : > { %v659_v46 = vpop.f32.mrf.mxu1  ;;  %v631_v7 = vadd.f32 %v3908_v40, %v630_v45 }
  0xbd   : > { %v660_v13 = vadd.f32 %v659_v46, %v631_v7 }
  0xbf   : > { %v678_v17 = vmax.f32 %v660_v13, 0.0  ;;  %v3744_v13 = vld [vmem:[%s4881_s4 + $0x28] sm:$0xff] }
  0xc1   : > { %v4203_v27 = vpack.c.bf16 %v678_v17, %v677_v19 }
  0xc2   : > { %v633_v47 = vpop.f32.mrf.mxu0 }
  0xc3   : > { %v662_v48 = vpop.f32.mrf.mxu1  ;;  %v634_v3 = vadd.f32 %v3908_v40, %v633_v47 }
  0xc5   : > { %v663_v11 = vadd.f32 %v662_v48, %v634_v3  ;;  %v3163_v3 = vld [vmem:[%s4880_s3 + $0x50] sm:$0xf] }
  0xc7   : > { %v679_v16 = vmax.f32 %v663_v11, 0.0  ;;  %v3772_v11 = vld [vmem:[%s4880_s3 + $0x60] sm:$0x10] }
  0xca   : > { %v635_v49 = vpop.f32.mrf.mxu0 }
  0xcb   : > { %v664_v50 = vpop.f32.mrf.mxu1  ;;  %v636_v0 = vadd.f32 %v3908_v40, %v635_v49  ;;  %v3003_v49 = vld [vmem:[%s4880_s3 + $0x10] sm:$0xf] }
  0xcd   : > { %v665_v8 = vadd.f32 %v664_v50, %v636_v0  ;;  %v3742_v50 = vld [vmem:[%s4880_s3 + $0x10] sm:$0x10]  ;;  %v3223_v0 = vld [vmem:[%s4880_s3 + $0x68] sm:$0xf] }
  0xcf   : > { %v680_v14 = vmax.f32 %v665_v8, 0.0 }
  0xd1   : > { %v4177_v18 = vpack.c.bf16 %v680_v14, %v679_v16  ;;  %v3243_v14 = vld [vmem:[%s4880_s3 + $0x70] sm:$0xf]  ;;  %v3743_v16 = vld [vmem:[%s4881_s4 + $0x20] sm:$0xff] }
  0xd2   : > { %v638_v51 = vpop.f32.mrf.mxu0 }
  0xd3   : > { %v667_v52 = vpop.f32.mrf.mxu1  ;;  %v639_v60 = vadd.f32 %v3908_v40, %v638_v51  ;;  %v3004_v51 = vor.u32 %v3742_v50, %v3003_v49  ;;  %v3762_v50 = vld [vmem:[%s4881_s4 + $0x88] sm:$0xff] }
  0xd5   : > { %v668_v4 = vadd.f32 %v667_v52, %v639_v60  ;;  %v3023_v52 = vld [vmem:[%s4880_s3 + $0x18] sm:$0xf] }
  0xd7   : > { %v681_v12 = vmax.f32 %v668_v4, 0.0  ;;  %v3766_v4 = vld [vmem:[%s4880_s3 + $0x50] sm:$0x10] }
  0xd8   : > { %v3164_v7 = vor.u32 %v3766_v4, %v3163_v3 }
  0xda   : > { %v640_v53 = vpop.f32.mrf.mxu0 }
  0xdb   : > { %v669_v54 = vpop.f32.mrf.mxu1  ;;  %v641_v58 = vadd.f32 %v3908_v40, %v640_v53  ;;  %v3745_v53 = vld [vmem:[%s4880_s3 + $0x18] sm:$0x10] }
  0xdd   : > { %v670_v1 = vadd.f32 %v669_v54, %v641_v58  ;;  %v3024_v54 = vor.u32 %v3745_v53, %v3023_v52  ;;  %v3083_v58 = vld [vmem:[%s4880_s3 + $0x30] sm:$0xf]  ;;  %v3771_v53 = vld [vmem:[%s4881_s4 + $0xb8] sm:$0xff] }
  0xdf   : > { %v682_v9 = vmax.f32 %v670_v1, 0.0  ;;  %v3775_v1 = vld [vmem:[%s4880_s3 + $0x68] sm:$0x10] }
  0xe1   : > { %v4172_v15 = vpack.c.bf16 %v682_v9, %v681_v12  ;;  %v3203_v9 = vld [vmem:[%s4880_s3 + $0x60] sm:$0xf] }
  0xe2   : > { %v643_v55 = vpop.f32.mrf.mxu0  ;;  %v3204_v12 = vor.u32 %v3772_v11, %v3203_v9  ;;  %v3783_v9 = vld [vmem:[%s4881_s4 + $0xf8] sm:$0xff]  ;;  %v3773_v11 = vld [vmem:[%s4881_s4 + $0xc0] sm:$0xff] }
  0xe3   : > { %v672_v56 = vpop.f32.mrf.mxu1  ;;  %v644_v57 = vadd.f32 %v3908_v40, %v643_v55  ;;  %v3043_v55 = vld [vmem:[%s4880_s3 + $0x20] sm:$0xf] }
  0xe5   : > { %v673_v61 = vadd.f32 %v672_v56, %v644_v57  ;;  %v3748_v56 = vld [vmem:[%s4880_s3 + $0x20] sm:$0x10] }
  0xe6   : > { %v3044_v57 = vor.u32 %v3748_v56, %v3043_v55  ;;  %v3770_v56 = vld [vmem:[%s4881_s4 + $0xb0] sm:$0xff] }
  0xe7   : > { %v683_v5 = vmax.f32 %v673_v61, 0.0  ;;  %v3123_v61 = vld [vmem:[%s4880_s3 + $0x40] sm:$0xf] }
  0xea   : > { %v645_v59 = vpop.f32.mrf.mxu0 }
  0xeb   : > { %v646_v62 = vadd.f32 %v3908_v40, %v645_v59  ;;  %v674_v63 = vpop.f32.mrf.mxu1  ;;  %v3184_v40 = vor.u32 %v3769_v39, %v3183_v38  ;;  %v3754_v59 = vld [vmem:[%s4880_s3 + $0x30] sm:$0x10] }
  0xec   : > { %v3084_v60 = vor.u32 %v3754_v59, %v3083_v58 }
  0xed   : > { %v675_v2 = vadd.f32 %v674_v63, %v646_v62  ;;  %v3760_v62 = vld [vmem:[%s4880_s3 + $0x40] sm:$0x10] }
  0xee   : > { %v3124_v63 = vor.u32 %v3760_v62, %v3123_v61 }
  0xef   : > { %v684_v6 = vmax.f32 %v675_v2, 0.0  ;;  %v3224_v2 = vor.u32 %v3775_v1, %v3223_v0  ;;  %v3767_v0 = vld [vmem:[%s4881_s4 + $0xa0] sm:$0xff] }
  0xf1   : > { %v4167_v10 = vpack.c.bf16 %v684_v6, %v683_v5  ;;  %v3263_v5 = vld [vmem:[%s4880_s3 + $0x78] sm:$0xf]  ;;  %v3781_v6 = vld [vmem:[%s4880_s3 + $0x78] sm:$0x10] }
  0xf2   : > { %v3264_v8 = vor.u32 %v3781_v6, %v3263_v5  ;;  %v3774_v6 = vld [vmem:[%s4881_s4 + $0xc8] sm:$0xff] }
  0xf3   : > { %704 = vmatpush.bf16.msra.mxu2 %v4167_v10  ;;  %734 = vmatpush.bf16.msra.mxu3 %v4167_v10 }
  0xf4   : > { %1010 = vmatpush.bf16.msrb.mxu0 %v4167_v10 }
  0xf7   : > { %705 = vmatpush.bf16.msra.mxu2 %v4172_v15  ;;  %735 = vmatpush.bf16.msra.mxu3 %v4172_v15 }
  0xf8   : > { %1011 = vmatpush.bf16.msrb.mxu0 %v4172_v15 }
  0xfb   : > { %706 = vmatpush.bf16.msra.mxu2 %v4177_v18  ;;  %736 = vmatpush.bf16.msra.mxu3 %v4177_v18 }
  0xfc   : > { %1012 = vmatpush.bf16.msrb.mxu0 %v4177_v18 }
  0xff   : > { %707 = vmatpush.bf16.msra.mxu2 %v4203_v27  ;;  %737 = vmatpush.bf16.msra.mxu3 %v4203_v27 }
 0x100   : > { %1013 = vmatpush.bf16.msrb.mxu0 %v4203_v27 }
 0x102   : > { %2969 = vmatmul.msk.bf16.vlgmr.msra.gmra.mxu2 %vm696_vm0, %v2968_v28  ;;  %2976 = vmatmul.msk.bf16.vlgmr.msra.gmra.mxu3 %vm696_vm0, %v2975_v29 }
 0x103   : > { %772 = vmatpush.bf16.msrb.mxu2 %v3741_v24  ;;  %3065 = vmatmul.msk.bf16.vlgmr.msrb.gmra.mxu0 %vm696_vm0, %v3064_v30  ;;  %v3750_v30 = vld [vmem:[%s4881_s4 + $0x48] sm:$0xff] }
 0x104   : > { %1134 = vmatpush.bf16.msra.mxu0 %v4167_v10  ;;  %801 = vmatpush.bf16.msrb.mxu3 %v3738_v41 }
 0x107   : > { %773 = vmatpush.bf16.msrb.mxu2 %v3740_v31 }
 0x108   : > { %1135 = vmatpush.bf16.msra.mxu0 %v4172_v15  ;;  %802 = vmatpush.bf16.msrb.mxu3 %v3737_v42 }
 0x10b   : > { %824 = vmatpush.bf16.msra.mxu2 %v4167_v10 }
 0x10c   : > { %1136 = vmatpush.bf16.msra.mxu0 %v4177_v18  ;;  %861 = vmatpush.bf16.msra.mxu3 %v3744_v13 }
 0x10f   : > { %825 = vmatpush.bf16.msra.mxu2 %v4172_v15 }
 0x110   : > { %1137 = vmatpush.bf16.msra.mxu0 %v4203_v27  ;;  %862 = vmatpush.bf16.msra.mxu3 %v3743_v16  ;;  %v3780_v16 = vld [vmem:[%s4881_s4 + $0xe8] sm:$0xff] }
 0x113   : > { %826 = vmatpush.bf16.msra.mxu2 %v4177_v18  ;;  %3105 = vmatmul.msk.bf16.vlgmr.msra.gmra.mxu0 %vm696_vm0, %v3104_v34  ;;  %v3749_v34 = vld [vmem:[%s4881_s4 + $0x40] sm:$0xff] }
 0x114   : > { %1258 = vmatpush.bf16.msrb.mxu0 %v4167_v10 }
 0x117   : > { %827 = vmatpush.bf16.msra.mxu2 %v4203_v27 }
 0x118   : > { %1259 = vmatpush.bf16.msrb.mxu0 %v4172_v15 }
 0x11c   : > { %1260 = vmatpush.bf16.msrb.mxu0 %v4177_v18 }
 0x120   : > { %1261 = vmatpush.bf16.msrb.mxu0 %v4203_v27 }
 0x123   : > { %3145 = vmatmul.msk.bf16.vlgmr.msrb.gmra.mxu0 %vm696_vm0, %v3144_v37 }
 0x124   : > { %1382 = vmatpush.bf16.msra.mxu0 %v4167_v10 }
 0x128   : > { %1383 = vmatpush.bf16.msra.mxu0 %v4172_v15 }
 0x12c   : > { %1384 = vmatpush.bf16.msra.mxu0 %v4177_v18 }
 0x130   : > { %1385 = vmatpush.bf16.msra.mxu0 %v4203_v27 }
 0x133   : > { %3185 = vmatmul.msk.bf16.vlgmr.msra.gmra.mxu0 %vm696_vm0, %v3184_v40  ;;  %v3756_v40 = vld [vmem:[%s4881_s4 + $0x68] sm:$0xff] }
 0x134   : > { %1506 = vmatpush.bf16.msrb.mxu0 %v4167_v10 }
 0x138   : > { %1507 = vmatpush.bf16.msrb.mxu0 %v4172_v15 }
 0x13c   : > { %1508 = vmatpush.bf16.msrb.mxu0 %v4177_v18 }
 0x140   : > { %1509 = vmatpush.bf16.msrb.mxu0 %v4203_v27 }
 0x143   : > { %3225 = vmatmul.msk.bf16.vlgmr.msrb.gmra.mxu0 %vm696_vm0, %v3224_v2  ;;  %v3776_v2 = vld [vmem:[%s4881_s4 + $0xd0] sm:$0xff] }
 0x144   : > { %1630 = vmatpush.bf16.msra.mxu0 %v4167_v10 }
 0x148   : > { %1631 = vmatpush.bf16.msra.mxu0 %v4172_v15 }
 0x14c   : > { %1632 = vmatpush.bf16.msra.mxu0 %v4177_v18 }
 0x150   : > { %1633 = vmatpush.bf16.msra.mxu0 %v4203_v27 }
 0x153   : > { %3265 = vmatmul.msk.bf16.vlgmr.msra.gmra.mxu0 %vm696_vm0, %v3264_v8 }
 0x180   : > { %v1015_v24 = vpop.f32.mrf.mxu0 }
 0x185   : > { %v709_v43 = vpop.f32.mrf.mxu2  ;;  %v739_v44 = vpop.f32.mrf.mxu3 }
 0x18d   : > { %v711_v45 = vpop.f32.mrf.mxu2  ;;  %v741_v46 = vpop.f32.mrf.mxu3 }
 0x18e   : > { %v714_v47 = vpack.c.bf16 %v711_v45, %v709_v43  ;;  %v744_v48 = vpack.c.bf16 %v741_v46, %v739_v44  ;;  %v3765_v43 = vld [vmem:[%s4881_s4 + $0x98] sm:$0xff]  ;;  %v3755_v44 = vld [vmem:[%s4881_s4 + $0x60] sm:$0xff]  ;;  %v3764_v46 = vld [vmem:[%s4881_s4 + $0x90] sm:$0xff] }
 0x190   : > { %2989 = vmatmul.msk.bf16.vlgmr.msrb.gmra.mxu2 %vm762_vm1, %v744_v48  ;;  %2998 = vmatmul.msk.bf16.vlgmr.msrb.gmra.mxu3 %vm762_vm1, %v714_v47 }
 0x191   : > { %886 = vmatpush.bf16.msrb.mxu2 %v4167_v10  ;;  %923 = vmatpush.bf16.msrb.mxu3 %v3747_v20 }
 0x195   : > { %887 = vmatpush.bf16.msrb.mxu2 %v4172_v15  ;;  %924 = vmatpush.bf16.msrb.mxu3 %v3746_v23 }
 0x199   : > { %888 = vmatpush.bf16.msrb.mxu2 %v4177_v18 }
 0x19d   : > { %889 = vmatpush.bf16.msrb.mxu2 %v4203_v27 }
 0x1a0   : > { %3005 = vmatmul.msk.bf16.vlgmr.msra.gmra.mxu2 %vm696_vm0, %v3004_v51 }
 0x1a1   : > { %948 = vmatpush.bf16.msra.mxu2 %v4167_v10 }
 0x1a5   : > { %949 = vmatpush.bf16.msra.mxu2 %v4172_v15 }
 0x1a9   : > { %950 = vmatpush.bf16.msra.mxu2 %v4177_v18 }
 0x1ad   : > { %951 = vmatpush.bf16.msra.mxu2 %v4203_v27 }
 0x1b0   : > { %3025 = vmatmul.msk.bf16.vlgmr.msrb.gmra.mxu2 %vm696_vm0, %v3024_v54  ;;  %v3761_v54 = vld [vmem:[%s4881_s4 + $0x80] sm:$0xff] }
 0x1b1   : > { %1072 = vmatpush.bf16.msrb.mxu2 %v4167_v10 }
 0x1b5   : > { %1073 = vmatpush.bf16.msrb.mxu2 %v4172_v15 }
 0x1b9   : > { %1074 = vmatpush.bf16.msrb.mxu2 %v4177_v18 }
 0x1bd   : > { %1075 = vmatpush.bf16.msrb.mxu2 %v4203_v27 }
 0x1c0   : > { %3045 = vmatmul.msk.bf16.vlgmr.msra.gmra.mxu2 %vm696_vm0, %v3044_v57 }
 0x1c1   : > { %1196 = vmatpush.bf16.msra.mxu2 %v4167_v10 }
 0x1c5   : > { %1197 = vmatpush.bf16.msra.mxu2 %v4172_v15 }
 0x1c9   : > { %1198 = vmatpush.bf16.msra.mxu2 %v4177_v18 }
 0x1cd   : > { %1199 = vmatpush.bf16.msra.mxu2 %v4203_v27 }
 0x1d0   : > { %3085 = vmatmul.msk.bf16.vlgmr.msrb.gmra.mxu2 %vm696_vm0, %v3084_v60  ;;  %v3768_v60 = vld [vmem:[%s4881_s4 + $0xa8] sm:$0xff] }
 0x1d1   : > { %1320 = vmatpush.bf16.msrb.mxu2 %v4167_v10 }
 0x1d5   : > { %1321 = vmatpush.bf16.msrb.mxu2 %v4172_v15 }
 0x1d9   : > { %1322 = vmatpush.bf16.msrb.mxu2 %v4177_v18 }
 0x1dd   : > { %1323 = vmatpush.bf16.msrb.mxu2 %v4203_v27 }
 0x1e0   : > { %3125 = vmatmul.msk.bf16.vlgmr.msra.gmra.mxu2 %vm696_vm0, %v3124_v63  ;;  %v3777_v63 = vld [vmem:[%s4881_s4 + $0xd8] sm:$0xff] }
 0x1e1   : > { %1444 = vmatpush.bf16.msra.mxu2 %v4167_v10 }
 0x1e5   : > { %1445 = vmatpush.bf16.msra.mxu2 %v4172_v15 }
 0x1e9   : > { %1446 = vmatpush.bf16.msra.mxu2 %v4177_v18 }
 0x1ed   : > { %1447 = vmatpush.bf16.msra.mxu2 %v4203_v27 }
 0x1f0   : > { %3165 = vmatmul.msk.bf16.vlgmr.msrb.gmra.mxu2 %vm696_vm0, %v3164_v7 }
 0x1f1   : > { %1568 = vmatpush.bf16.msrb.mxu2 %v4167_v10  ;;  %v3753_v10 = vld [vmem:[%s4881_s4 + $0x58] sm:$0xff] }
 0x1f2   : > { %1047 = vmatpush.bf16.msrb.mxu1 %v3753_v10  ;;  %v3782_v10 = vld [vmem:[%s4881_s4 + $0xf0] sm:$0xff] }
 0x1f5   : > { %1569 = vmatpush.bf16.msrb.mxu2 %v4172_v15  ;;  %v3778_v15 = vld [vmem:[%s4880_s3 + $0x70] sm:$0x10] }
 0x1f6   : > { %v3244_v17 = vor.u32 %v3778_v15, %v3243_v14  ;;  %1048 = vmatpush.bf16.msrb.mxu1 %v3752_v26 }
 0x1f9   : > { %1570 = vmatpush.bf16.msrb.mxu2 %v4177_v18 }
 0x1fa   : > { %1171 = vmatpush.bf16.msra.mxu1 %v3759_v33 }
 0x1fd   : > { %1571 = vmatpush.bf16.msrb.mxu2 %v4203_v27  ;;  %v1017_v27 = vpop.f32.mrf.mxu0 }
 0x1fe   : > { %v1020_v28 = vpack.c.bf16 %v1017_v27, %v1015_v24  ;;  %1172 = vmatpush.bf16.msra.mxu1 %v3758_v36 }
 0x200   : > { %3205 = vmatmul.msk.bf16.vlgmr.msra.gmra.mxu2 %vm696_vm0, %v3204_v12  ;;  %3078 = vmatmul.msk.bf16.vlgmr.msrb.gmra.mxu1 %vm762_vm1, %v1020_v28 }
 0x202   : > { %1295 = vmatpush.bf16.msrb.mxu1 %v3765_v43 }
 0x205   : > { %v1139_v32 = vpop.f32.mrf.mxu0 }
 0x206   : > { %1296 = vmatpush.bf16.msrb.mxu1 %v3764_v46 }
 0x20d   : > { %v1141_v37 = vpop.f32.mrf.mxu0 }
 0x20e   : > { %v1144_v38 = vpack.c.bf16 %v1141_v37, %v1139_v32 }
 0x210   : > { %3245 = vmatmul.msk.bf16.vlgmr.msrb.gmra.mxu2 %vm696_vm0, %v3244_v17  ;;  %3118 = vmatmul.msk.bf16.vlgmr.msra.gmra.mxu1 %vm762_vm1, %v1144_v38 }
 0x211   : > { %1419 = vmatpush.bf16.msra.mxu1 %v3771_v53  ;;  %v3791_v53 = vld [vmem:[%s4884_s7 + $0x38] sm:$0xff] }
 0x212   : > { %1779 = vmatpush.bf16.msrb.mxu0 %v3791_v53 }
 0x213   : > { %v775_v18 = vpop.f32.mrf.mxu2  ;;  %v804_v19 = vpop.f32.mrf.mxu3 }
 0x214   : > { %v4377_v21 = vadd.f32 %v804_v19, %v775_v18  ;;  %v3779_v18 = vld [vmem:[%s4881_s4 + $0xe0] sm:$0xff] }
 0x215   : > { %v1263_v42 = vpop.f32.mrf.mxu0  ;;  %1420 = vmatpush.bf16.msra.mxu1 %v3770_v56 }
 0x21b   : > { %v4379_v22 = vpop.f32.mrf.mxu2  ;;  %v806_v27 = vpop.f32.mrf.mxu3 }
 0x21d   : > { %v1265_v47 = vpop.f32.mrf.mxu0 }
 0x21e   : > { %v1268_v48 = vpack.c.bf16 %v1265_v47, %v1263_v42 }
 0x220   : > { %3158 = vmatmul.msk.bf16.vlgmr.msrb.gmra.mxu1 %vm762_vm1, %v1268_v48 }
 0x221   : > { %1543 = vmatpush.bf16.msrb.mxu1 %v3777_v63 }
 0x223   : > { %v829_v25 = vpop.f32.mrf.mxu2 }
 0x225   : > { %v1387_v52 = vpop.f32.mrf.mxu0  ;;  %1544 = vmatpush.bf16.msrb.mxu1 %v3776_v2 }
 0x22b   : > { %v831_v29 = vpop.f32.mrf.mxu2 }
 0x22c   : > { %v834_v31 = vpack.c.bf16 %v831_v29, %v829_v25 }
 0x22d   : > { %v1389_v57 = vpop.f32.mrf.mxu0 }
 0x22e   : > { %3018 = vmatmul.msk.bf16.vlgmr.msra.gmra.mxu3 %vm762_vm1, %v834_v31  ;;  %v1392_v58 = vpack.c.bf16 %v1389_v57, %v1387_v52 }
 0x22f   : > { %985 = vmatpush.bf16.msra.mxu3 %v3750_v30 }
 0x230   : > { %3198 = vmatmul.msk.bf16.vlgmr.msra.gmra.mxu1 %vm762_vm1, %v1392_v58  ;;  %v3790_v58 = vld [vmem:[%s4884_s7 + $0x30] sm:$0xff] }
 0x231   : > { %1667 = vmatpush.bf16.msra.mxu1 %v3783_v9  ;;  %1780 = vmatpush.bf16.msrb.mxu0 %v3790_v58  ;;  %v3405_v58 = vld [vmem:[%s4883_s6 + $0x5] sm:$0x1] }
 0x233   : > { %v891_v35 = vpop.f32.mrf.mxu2  ;;  %986 = vmatpush.bf16.msra.mxu3 %v3749_v34 }
 0x235   : > { %v1511_v62 = vpop.f32.mrf.mxu0  ;;  %1668 = vmatpush.bf16.msra.mxu1 %v3782_v10 }
 0x23b   : > { %v893_v39 = vpop.f32.mrf.mxu2 }
 0x23c   : > { %v896_v41 = vpack.c.bf16 %v893_v39, %v891_v35 }
 0x23d   : > { %v1513_v3 = vpop.f32.mrf.mxu0 }
 0x23e   : > { %3038 = vmatmul.msk.bf16.vlgmr.msrb.gmra.mxu3 %vm762_vm1, %v896_v41  ;;  %v1516_v4 = vpack.c.bf16 %v1513_v3, %v1511_v62 }
 0x23f   : > { %1109 = vmatpush.bf16.msrb.mxu3 %v3756_v40 }
 0x240   : > { %3238 = vmatmul.msk.bf16.vlgmr.msrb.gmra.mxu1 %vm762_vm1, %v1516_v4 }
 0x243   : > { %v953_v45 = vpop.f32.mrf.mxu2  ;;  %1110 = vmatpush.bf16.msrb.mxu3 %v3755_v44 }
 0x245   : > { %v1635_v8 = vpop.f32.mrf.mxu0 }
 0x24b   : > { %v955_v49 = vpop.f32.mrf.mxu2 }
 0x24c   : > { %v958_v51 = vpack.c.bf16 %v955_v49, %v953_v45 }
 0x24d   : > { %v1637_v13 = vpop.f32.mrf.mxu0 }
 0x24e   : > { %3058 = vmatmul.msk.bf16.vlgmr.msra.gmra.mxu3 %vm762_vm1, %v958_v51  ;;  %v1640_v14 = vpack.c.bf16 %v1637_v13, %v1635_v8 }
 0x24f   : > { %1233 = vmatpush.bf16.msra.mxu3 %v3762_v50  ;;  %v807_v50 = vadd.f32 %v806_v27, %v4379_v22  ;;  %v3789_v22 = vld [vmem:[%s4884_s7 + $0x28] sm:$0xff] }
 0x250   : > { %3278 = vmatmul.msk.bf16.vlgmr.msra.gmra.mxu1 %vm762_vm1, %v1640_v14  ;;  %1781 = vmatpush.bf16.msrb.mxu0 %v3789_v22  ;;  %v3799_v22 = vld [vmem:[%s4884_s7 + $0x78] sm:$0xff] }
 0x253   : > { %v1077_v55 = vpop.f32.mrf.mxu2  ;;  %1234 = vmatpush.bf16.msra.mxu3 %v3761_v54 }
 0x25b   : > { %v1079_v59 = vpop.f32.mrf.mxu2 }
 0x25c   : > { %v1082_v61 = vpack.c.bf16 %v1079_v59, %v1077_v55 }
 0x25e   : > { %3098 = vmatmul.msk.bf16.vlgmr.msrb.gmra.mxu3 %vm762_vm1, %v1082_v61 }
 0x25f   : > { %1357 = vmatpush.bf16.msrb.mxu3 %v3768_v60 }
 0x263   : > { %v1201_v1 = vpop.f32.mrf.mxu2  ;;  %1358 = vmatpush.bf16.msrb.mxu3 %v3767_v0  ;;  %v3788_v0 = vld [vmem:[%s4884_s7 + $0x20] sm:$0xff] }
 0x264   : > { %1782 = vmatpush.bf16.msrb.mxu0 %v3788_v0 }
 0x26b   : > { %v1203_v5 = vpop.f32.mrf.mxu2 }
 0x26c   : > { %v1206_v7 = vpack.c.bf16 %v1203_v5, %v1201_v1 }
 0x26e   : > { %3138 = vmatmul.msk.bf16.vlgmr.msra.gmra.mxu3 %vm762_vm1, %v1206_v7 }
 0x26f   : > { %1481 = vmatpush.bf16.msra.mxu3 %v3774_v6 }
 0x273   : > { %v1325_v12 = vpop.f32.mrf.mxu2  ;;  %1482 = vmatpush.bf16.msra.mxu3 %v3773_v11 }
 0x27b   : > { %v1327_v15 = vpop.f32.mrf.mxu2 }
 0x27c   : > { %v1330_v17 = vpack.c.bf16 %v1327_v15, %v1325_v12 }
 0x27d   : > { %v1050_v31 = vpop.f32.mrf.mxu1 }
 0x27e   : > { %3178 = vmatmul.msk.bf16.vlgmr.msrb.gmra.mxu3 %vm762_vm1, %v1330_v17 }
 0x27f   : > { %1605 = vmatpush.bf16.msrb.mxu3 %v3780_v16 }
 0x283   : > { %v1449_v19 = vpop.f32.mrf.mxu2  ;;  %1606 = vmatpush.bf16.msrb.mxu3 %v3779_v18  ;;  %v3909_v18 = vld [vmem:[%s4882_s5] ss:$0 sm:$0xff] }
 0x285   : > { %v1052_v34 = vpop.f32.mrf.mxu1 }
 0x28b   : > { %v1451_v20 = vpop.f32.mrf.mxu2 }
 0x28c   : > { %v1454_v23 = vpack.c.bf16 %v1451_v20, %v1449_v19 }
 0x28d   : > { %v1174_v37 = vpop.f32.mrf.mxu1 }
 0x28e   : > { %3218 = vmatmul.msk.bf16.vlgmr.msra.gmra.mxu3 %vm762_vm1, %v1454_v23 }
 0x293   : > { %v1573_v24 = vpop.f32.mrf.mxu2 }
 0x295   : > { %v1176_v41 = vpop.f32.mrf.mxu1 }
 0x29b   : > { %v1575_v25 = vpop.f32.mrf.mxu2 }
 0x29c   : > { %v1578_v26 = vpack.c.bf16 %v1575_v25, %v1573_v24 }
 0x29d   : > { %v1298_v43 = vpop.f32.mrf.mxu1 }
 0x29e   : > { %3258 = vmatmul.msk.bf16.vlgmr.msrb.gmra.mxu3 %vm762_vm1, %v1578_v26 }
 0x2a5   : > { %v1300_v45 = vpop.f32.mrf.mxu1 }
 0x2ad   : > { %v1422_v47 = vpop.f32.mrf.mxu1 }
 0x2b1   : > { %v864_v28 = vpop.f32.mrf.mxu3 }
 0x2b2   : > { %v869_v29 = vadd.f32 %v864_v28, %v4377_v21  ;;  %v3974_v28 = vmov 65535  }
 0x2b5   : > { %v1424_v49 = vpop.f32.mrf.mxu1 }
 0x2b9   : > { %v866_v30 = vpop.f32.mrf.mxu3 }
 0x2ba   : > { %v870_v51 = vadd.f32 %v866_v30, %v807_v50 }
 0x2bd   : > { %v1546_v57 = vpop.f32.mrf.mxu1 }
 0x2c1   : > { %v926_v32 = vpop.f32.mrf.mxu3 }
 0x2c2   : > { %v931_v33 = vadd.f32 %v926_v32, %v869_v29  ;;  %v1693_v29 = vsel %vm1691_vm2, 4294967295, %v3974_v28 }
 0x2c3   : > { %v1694_v32 = vsel %vm1692_vm3, %v1693_v29, 0 }
 0x2c5   : > { %v1548_v3 = vpop.f32.mrf.mxu1 }
 0x2c9   : > { %v928_v35 = vpop.f32.mrf.mxu3 }
 0x2ca   : > { %v932_v54 = vadd.f32 %v928_v35, %v870_v51  ;;  %v1686_v35 = vld [vmem:[%s4883_s6] sm:$0x1]  ;;  %v3486_v51 = vld [vmem:[%s4883_s6 + $0x8] sm:$0x1] }
 0x2cd   : > { %v1670_v12 = vpop.f32.mrf.mxu1 }
 0x2d1   : > { %v988_v36 = vpop.f32.mrf.mxu3 }
 0x2d2   : > { %v993_v38 = vadd.f32 %v988_v36, %v931_v33  ;;  %v3280_v36 = vld [vmem:[%s4883_s6 + $0x1] sm:$0x1] }
 0x2d4   : > { %v1055_v39 = vadd.f32 %v1050_v31, %v993_v38  ;;  %v3378_v38 = vld [vmem:[%s4883_s6 + $0x4] sm:$0x1] }
 0x2d5   : > { %v1672_v24 = vpop.f32.mrf.mxu1 }
 0x2d9   : > { %v990_v40 = vpop.f32.mrf.mxu3 }
 0x2da   : > { %v994_v55 = vadd.f32 %v990_v40, %v932_v54  ;;  %v3786_v40 = vld [vmem:[%s4884_s7 + $0x10] sm:$0xff] }
 0x2dc   : > { %v1056_v59 = vadd.f32 %v1052_v34, %v994_v55  ;;  %v3351_v55 = vld [vmem:[%s4883_s6 + $0x3] sm:$0x1] }
 0x2e1   : > { %v1112_v42 = vpop.f32.mrf.mxu3 }
 0x2e2   : > { %v1117_v56 = vadd.f32 %v1112_v42, %v1055_v39  ;;  %v3787_v39 = vld [vmem:[%s4884_s7 + $0x18] sm:$0xff]  ;;  %v3784_v42 = vld [vmem:[%s4884_s7] sm:$0xff] }
 0x2e3   : > { %1819 = vmatpush.bf16.msrb.mxu1 %v3787_v39  ;;  %v3812_v39 = vld [vmem:[%s4884_s7 + $0xe0] sm:$0xff] }
 0x2e4   : > { %v1179_v60 = vadd.f32 %v1174_v37, %v1117_v56  ;;  %v3324_v37 = vld [vmem:[%s4883_s6 + $0x2] sm:$0x1] }
 0x2e7   : > { %1820 = vmatpush.bf16.msrb.mxu1 %v3786_v40 }
 0x2e9   : > { %v1114_v44 = vpop.f32.mrf.mxu3 }
 0x2ea   : > { %v1118_v62 = vadd.f32 %v1114_v44, %v1056_v59  ;;  %v3794_v44 = vld [vmem:[%s4884_s7 + $0x50] sm:$0xff]  ;;  %v3459_v59 = vld [vmem:[%s4883_s6 + $0x7] sm:$0x1] }
 0x2ec   : > { %v1180_v1 = vadd.f32 %v1176_v41, %v1118_v62  ;;  %v3785_v41 = vld [vmem:[%s4884_s7 + $0x8] sm:$0xff] }
 0x2ed   : > { %1821 = vmatpush.bf16.msrb.mxu1 %v3785_v41  ;;  %v3801_v62 = vld [vmem:[%s4884_s7 + $0x88] sm:$0xff] }
 0x2f1   : > { %v1236_v46 = vpop.f32.mrf.mxu3  ;;  %1822 = vmatpush.bf16.msrb.mxu1 %v3784_v42 }
 0x2f2   : > { %v1241_v63 = vadd.f32 %v1236_v46, %v1179_v60  ;;  %v3792_v46 = vld [vmem:[%s4884_s7 + $0x40] sm:$0xff]  ;;  %v3803_v60 = vld [vmem:[%s4884_s7 + $0x98] sm:$0xff] }
 0x2f4   : > { %v1303_v2 = vadd.f32 %v1298_v43, %v1241_v63  ;;  %v3795_v43 = vld [vmem:[%s4884_s7 + $0x58] sm:$0xff]  ;;  %v3800_v63 = vld [vmem:[%s4884_s7 + $0x80] sm:$0xff] }
 0x2f5   : > { %1956 = vmatpush.bf16.msra.mxu1 %v3799_v22 }
 0x2f9   : > { %v1238_v48 = vpop.f32.mrf.mxu3 }
 0x2fa   : > { %v1242_v4 = vadd.f32 %v1238_v48, %v1180_v1 }
 0x2fc   : > { %v1304_v7 = vadd.f32 %v1300_v45, %v1242_v4  ;;  %v3793_v45 = vld [vmem:[%s4884_s7 + $0x48] sm:$0xff] }
 0x2fd   : > { %v3797_v4 = vld [vmem:[%s4884_s7 + $0x68] sm:$0xff] }
 0x301   : > { %v1360_v21 = vpop.f32.mrf.mxu3 }
 0x302   : > { %v1365_v5 = vadd.f32 %v1360_v21, %v1303_v2  ;;  %v3798_v2 = vld [vmem:[%s4884_s7 + $0x70] sm:$0xff] }
 0x303   : > { %1957 = vmatpush.bf16.msra.mxu1 %v3798_v2 }
 0x304   : > { %v1427_v8 = vadd.f32 %v1422_v47, %v1365_v5  ;;  %v3432_v47 = vld [vmem:[%s4883_s6 + $0x6] sm:$0x1]  ;;  %v3810_v5 = vld [vmem:[%s4884_s7 + $0xd0] sm:$0xff] }
 0x307   : > { %1958 = vmatpush.bf16.msra.mxu1 %v3797_v4  ;;  %v3555_v4 = vld [vmem:[%s4886_s9 + $0x48] sm:$0xf] }
 0x309   : > { %v1362_v52 = vpop.f32.mrf.mxu3 }
 0x30a   : > { %v1366_v9 = vadd.f32 %v1362_v52, %v1304_v7  ;;  %v3796_v7 = vld [vmem:[%s4884_s7 + $0x60] sm:$0xff] }
 0x30b   : > { %1959 = vmatpush.bf16.msra.mxu1 %v3796_v7 }
 0x30c   : > { %v1428_v13 = vadd.f32 %v1424_v49, %v1366_v9  ;;  %v3807_v9 = vld [vmem:[%s4884_s7 + $0xb8] sm:$0xff] }
 0x311   : > { %v1484_v61 = vpop.f32.mrf.mxu3 }
 0x312   : > { %v1489_v11 = vadd.f32 %v1484_v61, %v1427_v8  ;;  %v3802_v61 = vld [vmem:[%s4884_s7 + $0x90] sm:$0xff]  ;;  %v3809_v8 = vld [vmem:[%s4884_s7 + $0xc8] sm:$0xff] }
 0x314   : > { %v1551_v14 = vadd.f32 %v1546_v57, %v1489_v11  ;;  %v3808_v11 = vld [vmem:[%s4884_s7 + $0xc0] sm:$0xff] }
 0x319   : > { %v1486_v6 = vpop.f32.mrf.mxu3 }
 0x31a   : > { %v1490_v15 = vadd.f32 %v1486_v6, %v1428_v13  ;;  %v3806_v13 = vld [vmem:[%s4884_s7 + $0xb0] sm:$0xff] }
 0x31c   : > { %v1552_v19 = vadd.f32 %v1548_v3, %v1490_v15  ;;  %v3811_v3 = vld [vmem:[%s4884_s7 + $0xd8] sm:$0xff]  ;;  %v3805_v15 = vld [vmem:[%s4884_s7 + $0xa8] sm:$0xff] }
 0x321   : > { %v1608_v10 = vpop.f32.mrf.mxu3 }
 0x322   : > { %v1613_v16 = vadd.f32 %v1608_v10, %v1551_v14  ;;  %v3819_v14 = vld [vmem:[%s4884_s7 + $0x118] sm:$0xff] }
 0x324   : > { %v1675_v17 = vadd.f32 %v1670_v12, %v1613_v16  ;;  %v3818_v16 = vld [vmem:[%s4884_s7 + $0x110] sm:$0xff] }
 0x326   : > { %v1681_v25 = vadd.f32 %v3909_v18, %v1675_v17 }
 0x328   : > { %v1683_v30 = vmax.f32 %v1681_v25, 0.0  ;;  %v3816_v25 = vld [vmem:[%s4884_s7 + $0x100] sm:$0xff] }
 0x329   : > { %v1610_v20 = vpop.f32.mrf.mxu3 }
 0x32a   : > { %v1614_v23 = vadd.f32 %v1610_v20, %v1552_v19  ;;  %v3804_v20 = vld [vmem:[%s4884_s7 + $0xa0] sm:$0xff] }
 0x32c   : > { %v1676_v26 = vadd.f32 %v1672_v24, %v1614_v23  ;;  %v3817_v23 = vld [vmem:[%s4884_s7 + $0x108] sm:$0xff] }
 0x32e   : > { %v1682_v27 = vadd.f32 %v3909_v18, %v1676_v26 }
 0x330   : > { %v1684_v31 = vmax.f32 %v1682_v27, 0.0 }
 0x332   : > { %v1685_v33 = vpack.c.bf16 %v1684_v31, %v1683_v30 }
 0x334   : > { %v1696_v34 = vand.u32 %v1694_v32, %v1685_v33  ;;  %v3815_v32 = vld [vmem:[%s4884_s7 + $0xf8] sm:$0xff] }
 0x336   : > { %1705 = vmatpush.bf16.msra.mxu2 %v1696_v34  ;;  %1732 = vmatpush.bf16.msra.mxu3 %v1696_v34 }
 0x337   : > { %1909 = vmatpush.bf16.msra.mxu0 %v1696_v34 }
 0x339   : > { %3279 = vmatmul.msk.bf16.vlgmr.msra.gmra.mxu2 %vm1687_vm4, %v1686_v35  ;;  %3281 = vmatmul.msk.bf16.vlgmr.msra.gmra.mxu3 %vm1687_vm4, %v3280_v36 }
 0x33a   : > { %1840 = vmatpush.bf16.msrb.mxu2 %v1696_v34  ;;  %1887 = vmatpush.bf16.msrb.mxu3 %v3795_v43 }
 0x33e   : > { %1978 = vmatpush.bf16.msra.mxu2 %v1696_v34  ;;  %1888 = vmatpush.bf16.msrb.mxu3 %v3794_v44 }
 0x342   : > { %1889 = vmatpush.bf16.msrb.mxu3 %v3793_v45 }
 0x346   : > { %1890 = vmatpush.bf16.msrb.mxu3 %v3792_v46 }
 0x349   : > { %3325 = vmatmul.msk.bf16.vlgmr.msrb.gmra.mxu2 %vm1687_vm4, %v3324_v37 }
 0x34a   : > { %2116 = vmatpush.bf16.msrb.mxu2 %v1696_v34  ;;  %2025 = vmatpush.bf16.msra.mxu3 %v3803_v60  ;;  %v3573_v60 = vld [vmem:[%s4886_s9 + $0x78] sm:$0xf0] }
 0x34e   : > { %2026 = vmatpush.bf16.msra.mxu3 %v3802_v61 }
 0x352   : > { %2027 = vmatpush.bf16.msra.mxu3 %v3801_v62  ;;  %v3547_v62 = vld [vmem:[%s4886_s9 + $0x40] sm:$0xf] }
 0x356   : > { %2028 = vmatpush.bf16.msra.mxu3 %v3800_v63  ;;  %v3830_v63 = vld [vmem:[%s4886_s9 + $0x4c] sm:$0xf0] }
 0x357   : > { %v3548_v2 = vor.u32 %v3830_v63, %v3547_v62  ;;  %v3855_v63 = vld [vmem:[%s4888_s11 + $0x98] sm:$0xff] }
 0x359   : > { %3379 = vmatmul.msk.bf16.vlgmr.msra.gmra.mxu2 %vm1687_vm4, %v3378_v38  ;;  %v3813_v38 = vld [vmem:[%s4884_s7 + $0xe8] sm:$0xff] }
 0x35a   : > { %2254 = vmatpush.bf16.msra.mxu2 %v1696_v34 }
 0x369   : > { %3433 = vmatmul.msk.bf16.vlgmr.msrb.gmra.mxu2 %vm1687_vm4, %v3432_v47 }
 0x379   : > { %3487 = vmatmul.msk.bf16.vlgmr.msra.gmra.mxu2 %vm1687_vm4, %v3486_v51  ;;  %v3834_v51 = vld [vmem:[%s4886_s9 + $0x6c] sm:$0xf0] }
 0x3bc   : > { %v1707_v48 = vpop.f32.mrf.mxu2  ;;  %v1734_v21 = vpop.f32.mrf.mxu3 }
 0x3bd   : > { %v1711_v49 = vpack.c.bf16 %v1707_v48, %v1707_v48  ;;  %v1738_v50 = vpack.c.bf16 %v1734_v21, %v1734_v21 }
 0x3bf   : > { %3306 = vmatmul.msk.bf16.vlgmr.msrb.gmra.mxu0 %vm696_vm0, %v1738_v50  ;;  %3323 = vmatmul.msk.bf16.vlgmr.msrb.gmra.mxu1 %vm696_vm0, %v1711_v49  ;;  %v3563_v50 = vld [vmem:[%s4886_s9 + $0x60] sm:$0xf] }
 0x3c0   : > { %2047 = vmatpush.bf16.msrb.mxu0 %v1696_v34  ;;  %2094 = vmatpush.bf16.msrb.mxu1 %v3807_v9  ;;  %v3557_v9 = vld [vmem:[%s4886_s9 + $0x58] sm:$0xf0] }
 0x3c4   : > { %v1709_v52 = vpop.f32.mrf.mxu2  ;;  %v1736_v53 = vpop.f32.mrf.mxu3  ;;  %2095 = vmatpush.bf16.msrb.mxu1 %v3806_v13 }
 0x3c5   : > { %v3832_v52 = vld [vmem:[%s4886_s9 + $0x64] sm:$0xf]  ;;  %v3564_v53 = vor.u32 %v3834_v51, %v3563_v50  ;;  %v3841_v50 = vld [vmem:[%s4888_s11 + $0x28] sm:$0xff] }
 0x3c6   : > { %v3849_v51 = vld [vmem:[%s4888_s11 + $0x68] sm:$0xff] }
 0x3c8   : > { %2096 = vmatpush.bf16.msrb.mxu1 %v3805_v15  ;;  %v3533_v15 = vld [vmem:[%s4886_s9 + $0x30] sm:$0xf0] }
 0x3cc   : > { %v1842_v54 = vpop.f32.mrf.mxu2  ;;  %2097 = vmatpush.bf16.msrb.mxu1 %v3804_v20  ;;  %v3541_v20 = vld [vmem:[%s4886_s9 + $0x38] sm:$0xf0] }
 0x3cd   : > { %v1846_v56 = vpack.c.bf16 %v1842_v54, %v1842_v54  ;;  %v3565_v54 = vld [vmem:[%s4886_s9 + $0x70] sm:$0xf0] }
 0x3cf   : > { %3350 = vmatmul.msk.bf16.vlgmr.msrb.gmra.mxu3 %vm696_vm0, %v1846_v56  ;;  %3352 = vmatmul.msk.bf16.vlgmr.msra.gmra.mxu0 %vm1687_vm4, %v3351_v55  ;;  %v3571_v55 = vld [vmem:[%s4886_s9 + $0x68] sm:$0xf]  ;;  %v3835_v56 = vld [vmem:[%s4886_s9 + $0x74] sm:$0xf0] }
 0x3d0   : > { %2185 = vmatpush.bf16.msra.mxu0 %v1696_v34  ;;  %2163 = vmatpush.bf16.msrb.mxu3 %v3811_v3  ;;  %v3814_v34 = vld [vmem:[%s4884_s7 + $0xf0] sm:$0xff] }
 0x3d1   : > { %v3549_v3 = vld [vmem:[%s4886_s9 + $0x50] sm:$0xf0] }
 0x3d4   : > { %v1844_v57 = vpop.f32.mrf.mxu2  ;;  %2164 = vmatpush.bf16.msrb.mxu3 %v3810_v5  ;;  %v3831_v5 = vld [vmem:[%s4886_s9 + $0x54] sm:$0xf0] }
 0x3d5   : > { %v3568_v57 = vor.u32 %v3832_v52, %v3565_v54  ;;  %v3556_v7 = vor.u32 %v3831_v5, %v3555_v4  ;;  %v3857_v52 = vld [vmem:[%s4888_s11 + $0xa8] sm:$0xff]  ;;  %v2311_v5 = vld [vmem:[%s4885_s8] sm:$0x1] }
 0x3d8   : > { %2165 = vmatpush.bf16.msrb.mxu3 %v3809_v8  ;;  %v3829_v8 = vld [vmem:[%s4886_s9 + $0x4c] sm:$0xf] }
 0x3dc   : > { %v1980_v0 = vpop.f32.mrf.mxu2  ;;  %2166 = vmatpush.bf16.msrb.mxu3 %v3808_v11  ;;  %v3560_v11 = vor.u32 %v3829_v8, %v3557_v9 }
 0x3dd   : > { %v1984_v1 = vpack.c.bf16 %v1980_v0, %v1980_v0  ;;  %v3828_v0 = vld [vmem:[%s4886_s9 + $0x44] sm:$0xf] }
 0x3df   : > { %3406 = vmatmul.msk.bf16.vlgmr.msrb.gmra.mxu0 %vm1687_vm4, %v3405_v58  ;;  %3404 = vmatmul.msk.bf16.vlgmr.msra.gmra.mxu3 %vm696_vm0, %v1984_v1  ;;  %v3572_v58 = vor.u32 %v3835_v56, %v3571_v55  ;;  %v3840_v55 = vld [vmem:[%s4888_s11 + $0x20] sm:$0xff] }
 0x3e0   : > { %2301 = vmatpush.bf16.msra.mxu3 %v3819_v14  ;;  %2428 = vmatpush.bf16.msrb.mxu0 %v3564_v53  ;;  %v3824_v14 = vld [vmem:[%s4886_s9 + $0x24] sm:$0xf]  ;;  %v3865_v53 = vld [vmem:[%s4888_s11 + $0xe8] sm:$0xff] }
 0x3e1   : > { %2454 = vmatpush.bf16.msrb.mxu2 %v3572_v58  ;;  %v3848_v56 = vld [vmem:[%s4888_s11 + $0x60] sm:$0xff] }
 0x3e4   : > { %v1982_v6 = vpop.f32.mrf.mxu2  ;;  %2302 = vmatpush.bf16.msra.mxu3 %v3818_v16  ;;  %2429 = vmatpush.bf16.msrb.mxu0 %v3548_v2  ;;  %v3539_v16 = vld [vmem:[%s4886_s9 + $0x28] sm:$0xf] }
 0x3e5   : > { %v3552_v6 = vor.u32 %v3828_v0, %v3549_v3  ;;  %2455 = vmatpush.bf16.msrb.mxu2 %v3556_v7  ;;  %v3838_v0 = vld [vmem:[%s4888_s11 + $0x10] sm:$0xff] }
 0x3e8   : > { %2303 = vmatpush.bf16.msra.mxu3 %v3817_v23 }
 0x3ec   : > { %v2118_v12 = vpop.f32.mrf.mxu2  ;;  %2304 = vmatpush.bf16.msra.mxu3 %v3816_v25 }
 0x3ed   : > { %v2122_v10 = vpack.c.bf16 %v2118_v12, %v2118_v12  ;;  %v3531_v12 = vld [vmem:[%s4886_s9 + $0x20] sm:$0xf] }
 0x3ef   : > { %3460 = vmatmul.msk.bf16.vlgmr.msra.gmra.mxu0 %vm1687_vm4, %v3459_v59  ;;  %3458 = vmatmul.msk.bf16.vlgmr.msrb.gmra.mxu3 %vm696_vm0, %v2122_v10  ;;  %v3833_v59 = vld [vmem:[%s4886_s9 + $0x6c] sm:$0xf]  ;;  %v3826_v10 = vld [vmem:[%s4886_s9 + $0x2c] sm:$0xf0] }
 0x3f0   : > { %v3576_v61 = vor.u32 %v3833_v59, %v3573_v60  ;;  %v3532_v13 = vor.u32 %v3826_v10, %v3531_v12  ;;  %v3839_v60 = vld [vmem:[%s4888_s11 + $0x18] sm:$0xff]  ;;  %v3854_v12 = vld [vmem:[%s4888_s11 + $0x90] sm:$0xff] }
 0x3f1   : > { %v3862_v10 = vld [vmem:[%s4888_s11 + $0xd0] sm:$0xff] }
 0x3f2   : > { %2467 = vmatpush.bf16.msrb.mxu3 %v3576_v61  ;;  %2430 = vmatpush.bf16.msrb.mxu0 %v3532_v13  ;;  %v3847_v61 = vld [vmem:[%s4888_s11 + $0x58] sm:$0xff]  ;;  %v3836_v13 = vld [vmem:[%s4888_s11] sm:$0xff] }
 0x3f4   : > { %v2120_v17 = vpop.f32.mrf.mxu2 }
 0x3f5   : > { %v3536_v17 = vor.u32 %v3824_v14, %v3533_v15  ;;  %v3844_v14 = vld [vmem:[%s4888_s11 + $0x40] sm:$0xff]  ;;  %v3853_v15 = vld [vmem:[%s4888_s11 + $0x88] sm:$0xff] }
 0x3f6   : > { %2468 = vmatpush.bf16.msrb.mxu3 %v3560_v11 }
 0x3fc   : > { %v2256_v26 = vpop.f32.mrf.mxu2 }
 0x3fd   : > { %v2260_v28 = vpack.c.bf16 %v2256_v26, %v2256_v26  ;;  %v3515_v26 = vld [vmem:[%s4886_s9] sm:$0xf] }
 0x3ff   : > { %3512 = vmatmul.msk.bf16.vlgmr.msra.gmra.mxu3 %vm696_vm0, %v2260_v28  ;;  %v3820_v28 = vld [vmem:[%s4886_s9 + $0x4] sm:$0xf] }
 0x404   : > { %v2258_v30 = vpop.f32.mrf.mxu2 }
 0x43c   : > { %v1784_v18 = vpop.f32.mrf.mxu0  ;;  %v1824_v19 = vpop.f32.mrf.mxu1 }
 0x43d   : > { %v1825_v24 = vadd.f32 %v1824_v19, %v1784_v18  ;;  %v3827_v18 = vld [vmem:[%s4886_s9 + $0x34] sm:$0xf0]  ;;  %v3825_v19 = vld [vmem:[%s4886_s9 + $0x2c] sm:$0xf] }
 0x43e   : > { %v3544_v25 = vor.u32 %v3825_v19, %v3541_v20  ;;  %v2331_v19 = vld [vmem:[%s4887_s10] sm:$0xf] }
 0x43f   : > { %v2413_v20 = vperm.slane %v2331_v19, 0 }
 0x440   : > { %2469 = vmatpush.bf16.msrb.mxu3 %v3544_v25 }
 0x444   : > { %v1786_v27 = vpop.f32.mrf.mxu0  ;;  %v1826_v29 = vpop.f32.mrf.mxu1 }
 0x445   : > { %v3822_v27 = vld [vmem:[%s4886_s9 + $0xc] sm:$0xf0] }
 0x446   : > { %v3516_v30 = vor.u32 %v3822_v27, %v3515_v26 }
 0x448   : > { %2431 = vmatpush.bf16.msrb.mxu0 %v3516_v30  ;;  %v2415_v30 = vperm.slane %v2331_v19, 2 }
 0x44c   : > { %v1911_v31 = vpop.f32.mrf.mxu0 }
 0x44d   : > { %v1915_v33 = vpack.c.bf16 %v1911_v31, %v1911_v31  ;;  %v3517_v31 = vld [vmem:[%s4886_s9 + $0x10] sm:$0xf0] }
 0x44f   : > { %3377 = vmatmul.msk.bf16.vlgmr.msra.gmra.mxu1 %vm696_vm0, %v1915_v33  ;;  %v3823_v33 = vld [vmem:[%s4886_s9 + $0x14] sm:$0xf0] }
 0x450   : > { %2232 = vmatpush.bf16.msra.mxu1 %v3815_v32  ;;  %v3523_v32 = vld [vmem:[%s4886_s9 + $0x8] sm:$0xf] }
 0x452   : > { %v1892_v35 = vpop.f32.mrf.mxu3 }
 0x453   : > { %v4617_v36 = vadd.f32 %v1892_v35, %v1825_v24  ;;  %v3540_v24 = vor.u32 %v3827_v18, %v3539_v16  ;;  %v3524_v35 = vor.u32 %v3823_v33, %v3523_v32  ;;  %v3861_v16 = vld [vmem:[%s4888_s11 + $0xc8] sm:$0xff]  ;;  %v3860_v18 = vld [vmem:[%s4888_s11 + $0xc0] sm:$0xff] }
 0x454   : > { %v1913_v37 = vpop.f32.mrf.mxu0  ;;  %2233 = vmatpush.bf16.msra.mxu1 %v3814_v34  ;;  %v3520_v34 = vor.u32 %v3820_v28, %v3517_v31  ;;  %v2416_v31 = vperm.slane %v2331_v19, 3 }
 0x455   : > { %2456 = vmatpush.bf16.msrb.mxu2 %v3540_v24  ;;  %v3821_v37 = vld [vmem:[%s4886_s9 + $0xc] sm:$0xf] }
 0x458   : > { %2234 = vmatpush.bf16.msra.mxu1 %v3813_v38  ;;  %v3525_v38 = vld [vmem:[%s4886_s9 + $0x18] sm:$0xf0] }
 0x459   : > { %2457 = vmatpush.bf16.msrb.mxu2 %v3524_v35 }
 0x45a   : > { %v1894_v40 = vpop.f32.mrf.mxu3 }
 0x45b   : > { %v3843_v40 = vld [vmem:[%s4888_s11 + $0x38] sm:$0xff] }
 0x45c   : > { %v2049_v41 = vpop.f32.mrf.mxu0  ;;  %2235 = vmatpush.bf16.msra.mxu1 %v3812_v39  ;;  %v3528_v39 = vor.u32 %v3821_v37, %v3525_v38  ;;  %2741 = vmatpush.bf16.msra.mxu0 %v3843_v40 }
 0x45d   : > { %v2053_v42 = vpack.c.bf16 %v2049_v41, %v2049_v41  ;;  %v3851_v41 = vld [vmem:[%s4888_s11 + $0x78] sm:$0xff] }
 0x45e   : > { %2470 = vmatpush.bf16.msrb.mxu3 %v3528_v39 }
 0x45f   : > { %3431 = vmatmul.msk.bf16.vlgmr.msrb.gmra.mxu1 %vm696_vm0, %v2053_v42  ;;  %v3859_v42 = vld [vmem:[%s4888_s11 + $0xb8] sm:$0xff] }
 0x460   : > { %2441 = vmatpush.bf16.msrb.mxu1 %v3568_v57  ;;  %2767 = vmatpush.bf16.msra.mxu2 %v3859_v42  ;;  %v3856_v57 = vld [vmem:[%s4888_s11 + $0xa0] sm:$0xff] }
 0x462   : > { %v4627_v47 = vpop.f32.mrf.mxu3 }
 0x464   : > { %v2051_v43 = vpop.f32.mrf.mxu0  ;;  %2442 = vmatpush.bf16.msrb.mxu1 %v3552_v6 }
 0x465   : > { %v3867_v43 = vld [vmem:[%s4888_s11 + $0xf8] sm:$0xff] }
 0x466   : > { %2780 = vmatpush.bf16.msra.mxu3 %v3867_v43 }
 0x468   : > { %2443 = vmatpush.bf16.msrb.mxu1 %v3536_v17  ;;  %v3852_v17 = vld [vmem:[%s4888_s11 + $0x80] sm:$0xff] }
 0x46a   : > { %v2032_v48 = vpop.f32.mrf.mxu3 }
 0x46b   : > { %v3866_v48 = vld [vmem:[%s4888_s11 + $0xf0] sm:$0xff] }
 0x46c   : > { %v2187_v44 = vpop.f32.mrf.mxu0  ;;  %2444 = vmatpush.bf16.msrb.mxu1 %v3520_v34  ;;  %2781 = vmatpush.bf16.msra.mxu3 %v3866_v48 }
 0x46d   : > { %v2191_v45 = vpack.c.bf16 %v2187_v44, %v2187_v44  ;;  %v3842_v44 = vld [vmem:[%s4888_s11 + $0x30] sm:$0xff] }
 0x46e   : > { %2742 = vmatpush.bf16.msra.mxu0 %v3842_v44 }
 0x46f   : > { %3485 = vmatmul.msk.bf16.vlgmr.msra.gmra.mxu1 %vm696_vm0, %v2191_v45  ;;  %v3850_v45 = vld [vmem:[%s4888_s11 + $0x70] sm:$0xff] }
 0x470   : > { %2754 = vmatpush.bf16.msra.mxu1 %v3851_v41  ;;  %2782 = vmatpush.bf16.msra.mxu3 %v3865_v53 }
 0x472   : > { %v4629_v21 = vpop.f32.mrf.mxu3  ;;  %2743 = vmatpush.bf16.msra.mxu0 %v3841_v50  ;;  %v2548_v50 = vld [vmem:[%s4889_s12] sm:$0x1] }
 0x474   : > { %v2189_v46 = vpop.f32.mrf.mxu0  ;;  %2755 = vmatpush.bf16.msra.mxu1 %v3850_v45 }
 0x475   : > { %v3858_v46 = vld [vmem:[%s4888_s11 + $0xb0] sm:$0xff] }
 0x476   : > { %2768 = vmatpush.bf16.msra.mxu2 %v3858_v46  ;;  %2744 = vmatpush.bf16.msra.mxu0 %v3840_v55 }
 0x478   : > { %2756 = vmatpush.bf16.msra.mxu1 %v3849_v51 }
 0x47a   : > { %v2170_v49 = vpop.f32.mrf.mxu3  ;;  %2769 = vmatpush.bf16.msra.mxu2 %v3857_v52  ;;  %2745 = vmatpush.bf16.msra.mxu0 %v3839_v60 }
 0x47c   : > { %2757 = vmatpush.bf16.msra.mxu1 %v3848_v56 }
 0x47e   : > { %2770 = vmatpush.bf16.msra.mxu2 %v3856_v57  ;;  %2746 = vmatpush.bf16.msra.mxu0 %v3838_v0 }
 0x480   : > { %2758 = vmatpush.bf16.msra.mxu1 %v3847_v61 }
 0x482   : > { %v4655_v22 = vpop.f32.mrf.mxu3  ;;  %2771 = vmatpush.bf16.msra.mxu2 %v3855_v63 }
 0x486   : > { %2772 = vmatpush.bf16.msra.mxu2 %v3854_v12 }
 0x48a   : > { %v2308_v23 = vpop.f32.mrf.mxu3  ;;  %2773 = vmatpush.bf16.msra.mxu2 %v3853_v15 }
 0x48b   : > { %v2414_v23 = vperm.slane %v2331_v19, 1 }
 0x48e   : > { %2774 = vmatpush.bf16.msra.mxu2 %v3852_v17 }
 0x4cc   : > { %v4666_v1 = vpop.f32.mrf.mxu1 }
 0x4cd   : > { %v1965_v54 = vadd.f32 %v4666_v1, %v4617_v36  ;;  %v3864_v36 = vld [vmem:[%s4888_s11 + $0xe0] sm:$0xff]  ;;  %v3846_v1 = vld [vmem:[%s4888_s11 + $0x50] sm:$0xff] }
 0x4ce   : > { %2783 = vmatpush.bf16.msra.mxu3 %v3864_v36  ;;  %2759 = vmatpush.bf16.msra.mxu1 %v3846_v1 }
 0x4cf   : > { %v2034_v59 = vadd.f32 %v4627_v47, %v1965_v54  ;;  %v3863_v47 = vld [vmem:[%s4888_s11 + $0xd8] sm:$0xff] }
 0x4d2   : > { %2784 = vmatpush.bf16.msra.mxu3 %v3863_v47 }
 0x4d4   : > { %v1963_v29 = vpop.f32.mrf.mxu1 }
 0x4d6   : > { %2785 = vmatpush.bf16.msra.mxu3 %v3862_v10 }
 0x4da   : > { %2786 = vmatpush.bf16.msra.mxu3 %v3861_v16 }
 0x4dc   : > { %v2099_v49 = vpop.f32.mrf.mxu1 }
 0x4dd   : > { %v2103_v62 = vadd.f32 %v2099_v49, %v2034_v59 }
 0x4de   : > { %2787 = vmatpush.bf16.msra.mxu3 %v3860_v18 }
 0x4df   : > { %v2172_v2 = vadd.f32 %v4629_v21, %v2103_v62  ;;  %v3837_v21 = vld [vmem:[%s4888_s11 + $0x8] sm:$0xff] }
 0x4e0   : > { %2747 = vmatpush.bf16.msra.mxu0 %v3837_v21 }
 0x4e4   : > { %v2101_v58 = vpop.f32.mrf.mxu1  ;;  %2748 = vmatpush.bf16.msra.mxu0 %v3836_v13 }
 0x4ec   : > { %v2237_v3 = vpop.f32.mrf.mxu1 }
 0x4ed   : > { %v2241_v4 = vadd.f32 %v2237_v3, %v2172_v2 }
 0x4ef   : > { %v2310_v6 = vadd.f32 %v4655_v22, %v2241_v4  ;;  %v3845_v22 = vld [vmem:[%s4888_s11 + $0x48] sm:$0xff] }
 0x4f0   : > { %2760 = vmatpush.bf16.msra.mxu1 %v3845_v22 }
 0x4f1   : > { %v2312_v7 = vadd.f32 %v2311_v5, %v2310_v6 }
 0x4f3   : > { %v2313_v8 = vmax.f32 %v2312_v7, 0.0 }
 0x4f4   : > { %v2239_v9 = vpop.f32.mrf.mxu1  ;;  %2761 = vmatpush.bf16.msra.mxu1 %v3844_v14 }
 0x4f5   : > { %v2314_v11 = vpack.c.bf16 %v2313_v8, %v2313_v8 }
 0x4f7   : > { %3577 = vmatmul.msk.bf16.vlgmr.msrb.gmra.mxu0 %vm696_vm0, %v2314_v11  ;;  %3578 = vmatmul.msk.bf16.vlgmr.msrb.gmra.mxu1 %vm696_vm0, %v2314_v11 }
 0x4f8   : > { %3579 = vmatmul.msk.bf16.vlgmr.msrb.gmra.mxu2 %vm696_vm0, %v2314_v11  ;;  %3580 = vmatmul.msk.bf16.vlgmr.msrb.gmra.mxu3 %vm696_vm0, %v2314_v11 }
 0x574   : > { %v2433_v24 = vpop.f32.mrf.mxu0  ;;  %v2446_v25 = vpop.f32.mrf.mxu1 }
 0x575   : > { %v2434_v26 = vadd.f32 %v2433_v24, %v2413_v20  ;;  %v2447_v27 = vadd.f32 %v2446_v25, %v2414_v23 }
 0x577   : > { %v2476_v28 = vmax.f32 %v2434_v26, 0.0  ;;  %v2477_v29 = vmax.f32 %v2447_v27, 0.0 }
 0x579   : > { %v2480_v32 = vpack.c.bf16 %v2476_v28, %v2476_v28  ;;  %v2481_v33 = vpack.c.bf16 %v2477_v29, %v2477_v29 }
 0x57b   : > { %v2459_v34 = vpop.f32.mrf.mxu2  ;;  %v2472_v35 = vpop.f32.mrf.mxu3  ;;  %2749 = vmatmul.bf16.vlgmr.msra.gmra.mxu0 %v2480_v32  ;;  %2762 = vmatmul.bf16.vlgmr.msra.gmra.mxu1 %v2481_v33 }
 0x57c   : > { %v2460_v37 = vadd.f32 %v2459_v34, %v2415_v30  ;;  %v2473_v38 = vadd.f32 %v2472_v35, %v2416_v31  ;;  %v2435_v39 = vpop.f32.mrf.mxu0  ;;  %v2448_v40 = vpop.f32.mrf.mxu1 }
 0x57e   : > { %v2478_v41 = vmax.f32 %v2460_v37, 0.0  ;;  %v2479_v42 = vmax.f32 %v2473_v38, 0.0 }
 0x580   : > { %v2482_v43 = vpack.c.bf16 %v2478_v41, %v2478_v41  ;;  %v2483_v44 = vpack.c.bf16 %v2479_v42, %v2479_v42 }
 0x582   : > { %2775 = vmatmul.bf16.vlgmr.msra.gmra.mxu2 %v2482_v43  ;;  %2788 = vmatmul.bf16.vlgmr.msra.gmra.mxu3 %v2483_v44 }
 0x583   : > { %v2461_v45 = vpop.f32.mrf.mxu2  ;;  %v2474_v46 = vpop.f32.mrf.mxu3 }
 0x5f8   : > { %v2750_v48 = vpop.f32.mrf.mxu0  ;;  %v2763_v49 = vpop.f32.mrf.mxu1 }
 0x5f9   : > { %v2751_v51 = vadd.f32 %v2750_v48, %v2548_v50 }
 0x5fb   : > { %v2764_v54 = vadd.f32 %v2763_v49, %v2751_v51 }
 0x600   : > { %v2752_v52 = vpop.f32.mrf.mxu0  ;;  %v2765_v53 = vpop.f32.mrf.mxu1 }
 0x605   : > { %v2776_v55 = vpop.f32.mrf.mxu2  ;;  %v2789_v56 = vpop.f32.mrf.mxu3 }
 0x606   : > { %v2777_v57 = vadd.f32 %v2776_v55, %v2764_v54 }
 0x608   : > { %v2790_v36 = vadd.f32 %v2789_v56, %v2777_v57 }
 0x60a   : > { %2794 = vst.msk [vmem:[%s432_s22] sm:$0x1] %vm2793_vm5, %v2790_v36 }
 0x60b   : > { %3937 = shalt.err (!%p3934_p3)
}
 0x60c   : > { %3868 = dma.vmem_to_hbm [thread:$0]  (%p4083_p5), %s2807_s23, 16, %s2809_s21, %s2796_s27  }
 0x60d   : > { %v2778_v58 = vpop.f32.mrf.mxu2  ;;  %v2791_v59 = vpop.f32.mrf.mxu3 }
 0x60e PF: > { %s4903_s15 = sld [smem:[#allocation5_spill]]  ;;  %p3874_p4 = scmp.ge.s32.totalorder %s3972_s28, 2 }
 0x610   : > { %p3871_p7 = pnand %p3874_p4, %p4087_p6 }
 0x612   : > { %p3872_p8 = pneg %p3871_p7 }
 0x614   : > { %s2820_s17 = sand.u32 1, %s4903_s15  }
 0x615   : > { %s2821_s22 = scalar_lea.sflag [#allocation3], %s2820_s17 }
 0x616   : > { %3955 = dma.done.wait (%p3872_p8), %s2821_s22, 16  }
 0x617   : > { %3957 = vsyncadd (%p3872_p8), %s2821_s22, 4294967280  ;;  %s4905_s28 = sld [smem:[#allocation7_spill]]  ;;  %s4908_s25 = smov %s3964_s26 }
 0x618   : > { %s4906_s14 = sld [smem:[#allocation6_spill]] }
 0x619   : > { %s4907_s27 = sld [smem:[#allocation8_spill]] }
 0x61d   : > { %p23_p5 = scmp.ge.s32.totalorder %s4905_s28, 4  }
 0x61e   : > { %s4909_s26 = smov %s4906_s14 }
 0x61f   :  { %25 = sbr.rel (!%p23_p5) target bundleno = 3 (0x3), region = 153 }
 0x624   :  { %2826 = vsyncpa [#allocation3], 1 }
 0x625   :  { %2828 = vsyncpa [#allocation3 + $0x1], 1 }

</bundles_post_ra>
